<compile_context>
chip_gen: v7x
topology: tpu7x:2x2x1
jax: 0.10.0
libtpu: 0.0.40
codegen_flags: <defaults>
</compile_context>

<pallas_src>
import jax
import jax.numpy as jnp
import numpy as np
from jax.experimental import pallas as pl
from jax.experimental.pallas import tpu as pltpu

_HI = jax.lax.Precision.HIGHEST  # exact-f32 XLA dots (matches the in-kernel f32 MXU path)


def _softplus(x):
    # numerically stable softplus (matches F.softplus / jax.nn.softplus)
    return jnp.maximum(x, 0.0) + jnp.log1p(jnp.exp(-jnp.abs(x)))


def decoder_kernel(idx_ref, zw_src_ref, zw_dst_ref, b_all_ref, wo_ref, bo_ref,
                   znode_ref, zedge_ref):
    t = pl.program_id(1)                                # inner edge-tile axis ('arbitrary')
    te = idx_ref.shape[0]
    n_nodes = zw_src_ref.shape[0]
    h = zw_src_ref.shape[1] // 4

    src = idx_ref[:, 0:1]                                              # [TE, 1] int32
    dst = idx_ref[:, 1:2]                                              # [TE, 1] int32

    # One-hot gather matrix built in-kernel (cheap VPU compares vs iota).
    # Padded edges MUST carry the sentinel index == n_nodes -> all-zero rows
    # -> they contribute nothing to either output.  Do not change the sentinel.
    iota_en = jax.lax.broadcasted_iota(jnp.int32, (te, n_nodes), 1)    # [TE, N]
    g_src = (iota_en == src).astype(jnp.float32)                       # [TE, N]
    g_dst = (iota_en == dst).astype(jnp.float32)                       # [TE, N]

    # Fused gather + (lin_f | lin_s | ffw) in one 4H-wide slab: 2 GEMMs total.
    allout = (jnp.dot(g_src, zw_src_ref[...], preferred_element_type=jnp.float32)
              + jnp.dot(g_dst, zw_dst_ref[...], preferred_element_type=jnp.float32)
              + b_all_ref[...])                                        # [TE, 4H]
    f = allout[:, :h]                                                  # CGConv gate pre-act
    s = allout[:, h:2 * h]                                             # CGConv core pre-act
    hid = jnp.maximum(allout[:, 2 * h:], 0.0)                          # ffw: Linear + ReLU

    # Edge path, transposed & lane-dense ('ok,ek->oe'): [O8, TE].
    zedge_t = (jax.lax.dot_general(wo_ref[...], hid,
                                   dimension_numbers=(((1,), (1,)), ((), ())),
                                   preferred_element_type=jnp.float32)
               + bo_ref[...])                                          # [O8, TE]
    zedge_ref[...] = zedge_t.astype(zedge_ref.dtype)

    # Node path: CGConv message, scatter-add = g_dst^T @ msg on the MXU
    # (same one-hot reused via a transposed contraction — no [N, TE] matrix).
    msg = jax.nn.sigmoid(f) * _softplus(s)                             # [TE, H]
    agg = jax.lax.dot_general(g_dst, msg,
                              dimension_numbers=(((0,), (0,)), ((), ())),
                              preferred_element_type=jnp.float32)      # [N, H]

    @pl.when(t == 0)
    def _():
        znode_ref[...] = agg        # init merged with first accumulation

    @pl.when(t > 0)
    def _():
        znode_ref[...] += agg


def decoder_forward(z, edge_attr, edge_index, params, *, edge_tile=None, num_cores=1):
    del edge_attr  # num_edge_features == 0 -> unused (see TODO above)
    N, H = z.shape
    src, dst = edge_index[0], edge_index[1]
    E = src.shape[0]

    wf, bf, ws, bs, wm, bm, wo, bo = params
    O = wo.shape[0]

    # ---- tile sizing: one big tile for small graphs, 512 rows otherwise ----
    if edge_tile is None:
        edge_tile = min(512, -(-max(E, 1) // 128) * 128)
    assert edge_tile % 128 == 0, "edge tile must be lane-aligned"
    n_tiles_needed = max(1, -(-E // edge_tile))
    tiles_per_core = -(-n_tiles_needed // num_cores)
    n_tiles = tiles_per_core * num_cores
    E_pad = n_tiles * edge_tile

    # ---- pad edges; padded edges point at the INVALID sentinel node id N ----
    pad = E_pad - E
    src_i = src.astype(jnp.int32)
    dst_i = dst.astype(jnp.int32)
    if pad:
        fill = jnp.full((pad,), N, jnp.int32)   # sentinel == N (never change to a valid id)
        src_i = jnp.concatenate([src_i, fill])
        dst_i = jnp.concatenate([dst_i, fill])
    idx = jnp.stack([src_i, dst_i], axis=1)                              # [E_pad, 2]

    # ---- fuse lin_f / lin_s / ffw weights and pre-multiply by z (grid-invariant).
    #      CGConv input is cat([z_dst, z_src]); ffw input is cat([z_src, z_dst]). ----
    zf = z.astype(jnp.float32)
    wf_t, ws_t, wm_t = wf.T, ws.T, wm.T                                  # [in, out]
    w_for_src = jnp.concatenate([wf_t[H:], ws_t[H:], wm_t[:H]], axis=1)  # [H, 4H]
    w_for_dst = jnp.concatenate([wf_t[:H], ws_t[:H], wm_t[H:]], axis=1)  # [H, 4H]
    b_all = jnp.concatenate([bf, bs, bm]).reshape(1, 4 * H)
    zw_src = jnp.dot(zf, w_for_src, precision=_HI)                       # [N, 4H]
    zw_dst = jnp.dot(zf, w_for_dst, precision=_HI)                       # [N, 4H]

    # ---- edge_out weights in row layout, output dim padded to a sublane multiple ----
    O8 = -(-O // 8) * 8
    wo_rows = jnp.pad(wo, ((0, O8 - O), (0, 0))).astype(jnp.float32)     # [O8, 2H]
    bo_col = jnp.pad(bo, (0, O8 - O)).astype(jnp.float32).reshape(O8, 1)  # [O8, 1]

    tpc = tiles_per_core
    grid_spec = pltpu.PrefetchScalarGridSpec(
        num_scalar_prefetch=0,
        grid=(num_cores, tiles_per_core),
        in_specs=[
            pl.BlockSpec((edge_tile, 2), lambda c, t: (c * tpc + t, 0)),    # packed src/dst
            pl.BlockSpec((N, 4 * H), lambda c, t: (0, 0)),                  # zw_src (resident)
            pl.BlockSpec((N, 4 * H), lambda c, t: (0, 0)),                  # zw_dst (resident)
            pl.BlockSpec((1, 4 * H), lambda c, t: (0, 0)),                  # fused bias
            pl.BlockSpec((O8, 2 * H), lambda c, t: (0, 0)),                 # edge_out W (rows)
            pl.BlockSpec((O8, 1), lambda c, t: (0, 0)),                     # edge_out b (col)
        ],
        out_specs=(
            pl.BlockSpec((None, N, H), lambda c, t: (c, 0, 0)),             # per-core node acc
            pl.BlockSpec((O8, edge_tile), lambda c, t: (0, c * tpc + t)),   # z_edge^T (lane-dense)
        ),
    )

    node_partials, z_edge_t = pl.pallas_call(
        decoder_kernel,
        grid_spec=grid_spec,
        out_shape=(jax.ShapeDtypeStruct((num_cores, N, H), jnp.float32),
                   jax.ShapeDtypeStruct((O8, E_pad), z.dtype)),
        compiler_params=pltpu.CompilerParams(
            # inner edge axis carries the scatter-add into the resident per-core
            # node block -> 'arbitrary'; leading core axis -> 'parallel' (v7x 2-TC).
            dimension_semantics=("parallel", "arbitrary"),
        ),
    )(idx, zw_src, zw_dst, b_all, wo_rows, bo_col)

    z_node = (zf + node_partials.sum(axis=0)).astype(z.dtype)   # residual + cross-core sum
    z_edge = z_edge_t.T[:E, :O].astype(z.dtype)
    return z_node, z_edge


def reference_forward(z, edge_attr, edge_index, params):
    del edge_attr
    src, dst = edge_index[0], edge_index[1]
    wf, bf, ws, bs, wm, bm, wo, bo = params
    z_src, z_dst = z[src], z[dst]
    ze = jnp.concatenate([z_src, z_dst], axis=-1)
    h = jnp.maximum(jnp.dot(ze, wm.T, precision=_HI) + bm, 0.0)
    z_edge = jnp.dot(h, wo.T, precision=_HI) + bo
    zc = jnp.concatenate([z_dst, z_src], axis=-1)
    msg = (jax.nn.sigmoid(jnp.dot(zc, wf.T, precision=_HI) + bf)
           * jax.nn.softplus(jnp.dot(zc, ws.T, precision=_HI) + bs))
    agg = jax.ops.segment_sum(msg, dst, num_segments=z.shape[0])
    return z + agg, z_edge


def init_params(key, H, O):
    ks = jax.random.split(key, 4)

    def linear(k, out_dim, in_dim):
        bound = 1.0 / np.sqrt(in_dim)
        k1, k2 = jax.random.split(k)
        w = jax.random.uniform(k1, (out_dim, in_dim), jnp.float32, -bound, bound)
        b = jax.random.uniform(k2, (out_dim,), jnp.float32, -bound, bound)
        return w, b

    wf, bf = linear(ks[0], H, 2 * H)       # CGConv lin_f
    ws, bs = linear(ks[1], H, 2 * H)       # CGConv lin_s
    wm, bm = linear(ks[2], 2 * H, 2 * H)   # ffw_layer (Linear + ReLU)
    wo, bo = linear(ks[3], O, 2 * H)       # edge_out_layer
    return wf, bf, ws, bs, wm, bm, wo, bo


if __name__ == "__main__":
    key = jax.random.PRNGKey(0)
    # nodes, hidden(=num_node_features), edges, output_dim
    N, H, E, O = 16, 32, 200, 4            # E=200 -> one 256-row edge tile (single grid step)

    k_z, k_src, k_dst, k_p = jax.random.split(key, 4)
    z = jax.random.normal(k_z, (N, H), jnp.float32)
    edge_attr = jnp.zeros((E, 0), jnp.float32)  # num_edge_features = 0
    src = jax.random.randint(k_src, (E,), 0, N, jnp.int32)
    dst = jax.random.randint(k_dst, (E,), 0, N, jnp.int32)
    edge_index = jnp.stack([src, dst], axis=0)

    params = init_params(k_p, H, O)

    z_node, z_edge = jax.jit(decoder_forward)(z, edge_attr, edge_index, params)
    jax.block_until_ready((z_node, z_edge))

    z_node_ref, z_edge_ref = reference_forward(z, edge_attr, edge_index, params)
    np.testing.assert_allclose(np.asarray(z_node), np.asarray(z_node_ref), rtol=1e-5, atol=1e-5)
    np.testing.assert_allclose(np.asarray(z_edge), np.asarray(z_edge_ref), rtol=1e-5, atol=1e-5)

    print("KERNEL_OK")
</pallas_src>

<mosaic_0001>
module attributes {stable_mosaic.version = 11 : i64} {
  func.func @decoder_kernel(%arg0: i32, %arg1: i32, %arg2: memref<256x2xi32, #tpu.memory_space<vmem>>, %arg3: memref<16x128xf32, #tpu.memory_space<vmem>>, %arg4: memref<16x128xf32, #tpu.memory_space<vmem>>, %arg5: memref<1x128xf32, #tpu.memory_space<vmem>>, %arg6: memref<8x64xf32, #tpu.memory_space<vmem>>, %arg7: memref<8x1xf32, #tpu.memory_space<vmem>>, %arg8: memref<1x16x32xf32, #tpu.memory_space<vmem>>, %arg9: memref<8x256xf32, #tpu.memory_space<vmem>>) attributes {dimension_semantics = [#tpu.dimension_semantics<parallel>, #tpu.dimension_semantics<arbitrary>], iteration_bounds = array<i64: 1, 1>, scalar_prefetch = 0 : i64, scratch_operands = 0 : i64, tpu.core_type = #tpu.core_type<tc>, window_params = [{transform_indices = @transform_0, window_bounds = array<i64: 256, 2>}, {pipeline_mode = #tpu.pipeline_mode<synchronous>, transform_indices = @transform_1, window_bounds = array<i64: 16, 128>}, {pipeline_mode = #tpu.pipeline_mode<synchronous>, transform_indices = @transform_2, window_bounds = array<i64: 16, 128>}, {pipeline_mode = #tpu.pipeline_mode<synchronous>, transform_indices = @transform_3, window_bounds = array<i64: 1, 128>}, {pipeline_mode = #tpu.pipeline_mode<synchronous>, transform_indices = @transform_4, window_bounds = array<i64: 8, 64>}, {pipeline_mode = #tpu.pipeline_mode<synchronous>, transform_indices = @transform_5, window_bounds = array<i64: 8, 1>}, {transform_indices = @transform_6, window_bounds = array<i64: 1, 16, 32>}, {transform_indices = @transform_7, window_bounds = array<i64: 8, 256>}]} {
    %c0 = arith.constant 0 : index
    %c0_0 = arith.constant 0 : index
    %0 = vector.load %arg2[%c0, %c0_0] : memref<256x2xi32, #tpu.memory_space<vmem>>, vector<256x1xi32>
    %c0_1 = arith.constant 0 : index
    %c1 = arith.constant 1 : index
    %1 = vector.load %arg2[%c0_1, %c1] : memref<256x2xi32, #tpu.memory_space<vmem>>, vector<256x1xi32>
    %2 = tpu.iota {dimensions = array<i32: 1>} : vector<256x16xi32>
    %3 = vector.broadcast %0 : vector<256x1xi32> to vector<256x16xi32>
    %4 = arith.cmpi eq, %2, %3 : vector<256x16xi32>
    %5 = arith.extui %4 : vector<256x16xi1> to vector<256x16xi32>
    %6 = arith.sitofp %5 : vector<256x16xi32> to vector<256x16xf32>
    %7 = vector.broadcast %1 : vector<256x1xi32> to vector<256x16xi32>
    %8 = arith.cmpi eq, %2, %7 : vector<256x16xi32>
    %9 = arith.extui %8 : vector<256x16xi1> to vector<256x16xi32>
    %10 = arith.sitofp %9 : vector<256x16xi32> to vector<256x16xf32>
    %c0_2 = arith.constant 0 : index
    %c0_3 = arith.constant 0 : index
    %11 = vector.load %arg3[%c0_2, %c0_3] : memref<16x128xf32, #tpu.memory_space<vmem>>, vector<16x128xf32>
    %cst = arith.constant dense<0.000000e+00> : vector<256x128xf32>
    %12 = tpu.matmul %6, %11, %cst {dimension_numbers = #tpu.dot_dimension_numbers<[1], [0], [0], [1], [0, 0, 1, 1], [], []>} : vector<256x16xf32>, vector<16x128xf32>, vector<256x128xf32> -> vector<256x128xf32>
    %c0_4 = arith.constant 0 : index
    %c0_5 = arith.constant 0 : index
    %13 = vector.load %arg4[%c0_4, %c0_5] : memref<16x128xf32, #tpu.memory_space<vmem>>, vector<16x128xf32>
    %cst_6 = arith.constant dense<0.000000e+00> : vector<256x128xf32>
    %14 = tpu.matmul %10, %13, %cst_6 {dimension_numbers = #tpu.dot_dimension_numbers<[1], [0], [0], [1], [0, 0, 1, 1], [], []>} : vector<256x16xf32>, vector<16x128xf32>, vector<256x128xf32> -> vector<256x128xf32>
    %15 = arith.addf %12, %14 : vector<256x128xf32>
    %c0_7 = arith.constant 0 : index
    %c0_8 = arith.constant 0 : index
    %16 = vector.load %arg5[%c0_7, %c0_8] : memref<1x128xf32, #tpu.memory_space<vmem>>, vector<1x128xf32>
    %17 = vector.broadcast %16 : vector<1x128xf32> to vector<256x128xf32>
    %18 = arith.addf %15, %17 : vector<256x128xf32>
    %19 = vector.extract_strided_slice %18 {offsets = [0, 0], sizes = [256, 32], strides = [1, 1]} : vector<256x128xf32> to vector<256x32xf32>
    %20 = vector.extract_strided_slice %18 {offsets = [0, 32], sizes = [256, 32], strides = [1, 1]} : vector<256x128xf32> to vector<256x32xf32>
    %21 = vector.extract_strided_slice %18 {offsets = [0, 64], sizes = [256, 64], strides = [1, 1]} : vector<256x128xf32> to vector<256x64xf32>
    %cst_9 = arith.constant 0.000000e+00 : f32
    %22 = vector.broadcast %cst_9 : f32 to vector<256x64xf32>
    %23 = arith.maximumf %21, %22 : vector<256x64xf32>
    %c0_10 = arith.constant 0 : index
    %c0_11 = arith.constant 0 : index
    %24 = vector.load %arg6[%c0_10, %c0_11] : memref<8x64xf32, #tpu.memory_space<vmem>>, vector<8x64xf32>
    %cst_12 = arith.constant dense<0.000000e+00> : vector<8x256xf32>
    %25 = tpu.matmul %24, %23, %cst_12 {dimension_numbers = #tpu.dot_dimension_numbers<[1], [1], [0], [0], [0, 0, 1, 0], [], []>} : vector<8x64xf32>, vector<256x64xf32>, vector<8x256xf32> -> vector<8x256xf32>
    %c0_13 = arith.constant 0 : index
    %c0_14 = arith.constant 0 : index
    %26 = vector.load %arg7[%c0_13, %c0_14] : memref<8x1xf32, #tpu.memory_space<vmem>>, vector<8x1xf32>
    %27 = vector.broadcast %26 : vector<8x1xf32> to vector<8x256xf32>
    %28 = arith.addf %25, %27 : vector<8x256xf32>
    %c0_15 = arith.constant 0 : index
    %c0_16 = arith.constant 0 : index
    %29 = vector.load %arg9[%c0_15, %c0_16] : memref<8x256xf32, #tpu.memory_space<vmem>>, vector<8x256xf32>
    tpu.vector_store %arg9[%c0_15, %c0_16], %28 {strides = array<i32>} : memref<8x256xf32, #tpu.memory_space<vmem>>, vector<8x256xf32>,
    %30 = arith.negf %19 : vector<256x32xf32>
    %31 = math.exp %30 : vector<256x32xf32>
    %cst_17 = arith.constant 1.000000e+00 : f32
    %32 = vector.broadcast %cst_17 : f32 to vector<256x32xf32>
    %33 = arith.addf %32, %31 : vector<256x32xf32>
    %34 = arith.divf %32, %33 : vector<256x32xf32>
    %cst_18 = arith.constant 0.000000e+00 : f32
    %35 = vector.broadcast %cst_18 : f32 to vector<256x32xf32>
    %36 = arith.maximumf %20, %35 : vector<256x32xf32>
    %37 = math.absf %20 : vector<256x32xf32>
    %cst_19 = arith.constant 0.000000e+00 : f32
    %38 = vector.broadcast %cst_19 : f32 to vector<256x32xf32>
    %39 = arith.subf %38, %37 : vector<256x32xf32>
    %40 = math.exp %39 : vector<256x32xf32>
    %41 = math.log1p %40 : vector<256x32xf32>
    %42 = arith.addf %36, %41 : vector<256x32xf32>
    %43 = arith.mulf %34, %42 : vector<256x32xf32>
    %cst_20 = arith.constant dense<0.000000e+00> : vector<16x32xf32>
    %44 = tpu.matmul %10, %43, %cst_20 {dimension_numbers = #tpu.dot_dimension_numbers<[0], [0], [1], [1], [0, 1, 1, 1], [], []>} : vector<256x16xf32>, vector<256x32xf32>, vector<16x32xf32> -> vector<16x32xf32>
    %c0_i32 = arith.constant 0 : i32
    %45 = arith.cmpi eq, %arg1, %c0_i32 : i32
    %46 = arith.extui %45 : i1 to i32
    %c0_i32_21 = arith.constant 0 : i32
    %47 = arith.cmpi ne, %46, %c0_i32_21 : i32
    scf.if %47 {
      %c0_24 = arith.constant 0 : index
      %c0_25 = arith.constant 0 : index
      %c0_26 = arith.constant 0 : index
      %51 = vector.load %arg8[%c0_24, %c0_25, %c0_26] : memref<1x16x32xf32, #tpu.memory_space<vmem>>, vector<1x16x32xf32>
      %52 = vector.shape_cast %51 : vector<1x16x32xf32> to vector<16x32xf32>
      %53 = vector.shape_cast %44 : vector<16x32xf32> to vector<1x16x32xf32>
      tpu.vector_store %arg8[%c0_24, %c0_25, %c0_26], %53 {strides = array<i32>} : memref<1x16x32xf32, #tpu.memory_space<vmem>>, vector<1x16x32xf32>,
    } else {
    }
    %c0_i32_22 = arith.constant 0 : i32
    %48 = arith.cmpi sgt, %arg1, %c0_i32_22 : i32
    %49 = arith.extui %48 : i1 to i32
    %c0_i32_23 = arith.constant 0 : i32
    %50 = arith.cmpi ne, %49, %c0_i32_23 : i32
    scf.if %50 {
      %c0_24 = arith.constant 0 : index
      %c0_25 = arith.constant 0 : index
      %c0_26 = arith.constant 0 : index
      %51 = vector.load %arg8[%c0_24, %c0_25, %c0_26] : memref<1x16x32xf32, #tpu.memory_space<vmem>>, vector<1x16x32xf32>
      %52 = vector.shape_cast %51 : vector<1x16x32xf32> to vector<16x32xf32>
      %53 = arith.addf %52, %44 : vector<16x32xf32>
      %c0_27 = arith.constant 0 : index
      %c0_28 = arith.constant 0 : index
      %c0_29 = arith.constant 0 : index
      %54 = vector.load %arg8[%c0_27, %c0_28, %c0_29] : memref<1x16x32xf32, #tpu.memory_space<vmem>>, vector<1x16x32xf32>
      %55 = vector.shape_cast %54 : vector<1x16x32xf32> to vector<16x32xf32>
      %56 = vector.shape_cast %53 : vector<16x32xf32> to vector<1x16x32xf32>
      tpu.vector_store %arg8[%c0_27, %c0_28, %c0_29], %56 {strides = array<i32>} : memref<1x16x32xf32, #tpu.memory_space<vmem>>, vector<1x16x32xf32>,
    } else {
    }
    return
  }
  func.func @transform_0(%arg0: i32, %arg1: i32) -> (i32, i32) {
    %c1_i32 = arith.constant 1 : i32
    %0 = arith.muli %arg0, %c1_i32 : i32
    %1 = arith.addi %0, %arg1 : i32
    %c0_i32 = arith.constant 0 : i32
    %c0_i32_0 = arith.constant 0 : i32
    return %1, %c0_i32 : i32, i32
  }
  func.func @transform_1(%arg0: i32, %arg1: i32) -> (i32, i32) {
    %c0_i32 = arith.constant 0 : i32
    %c0_i32_0 = arith.constant 0 : i32
    %c0_i32_1 = arith.constant 0 : i32
    return %c0_i32, %c0_i32_0 : i32, i32
  }
  func.func @transform_2(%arg0: i32, %arg1: i32) -> (i32, i32) {
    %c0_i32 = arith.constant 0 : i32
    %c0_i32_0 = arith.constant 0 : i32
    %c0_i32_1 = arith.constant 0 : i32
    return %c0_i32, %c0_i32_0 : i32, i32
  }
  func.func @transform_3(%arg0: i32, %arg1: i32) -> (i32, i32) {
    %c0_i32 = arith.constant 0 : i32
    %c0_i32_0 = arith.constant 0 : i32
    %c0_i32_1 = arith.constant 0 : i32
    return %c0_i32, %c0_i32_0 : i32, i32
  }
  func.func @transform_4(%arg0: i32, %arg1: i32) -> (i32, i32) {
    %c0_i32 = arith.constant 0 : i32
    %c0_i32_0 = arith.constant 0 : i32
    %c0_i32_1 = arith.constant 0 : i32
    return %c0_i32, %c0_i32_0 : i32, i32
  }
  func.func @transform_5(%arg0: i32, %arg1: i32) -> (i32, i32) {
    %c0_i32 = arith.constant 0 : i32
    %c0_i32_0 = arith.constant 0 : i32
    %c0_i32_1 = arith.constant 0 : i32
    return %c0_i32, %c0_i32_0 : i32, i32
  }
  func.func @transform_6(%arg0: i32, %arg1: i32) -> (i32, i32, i32) {
    %c0_i32 = arith.constant 0 : i32
    %c0_i32_0 = arith.constant 0 : i32
    %c0_i32_1 = arith.constant 0 : i32
    return %arg0, %c0_i32, %c0_i32_0 : i32, i32, i32
  }
  func.func @transform_7(%arg0: i32, %arg1: i32) -> (i32, i32) {
    %c1_i32 = arith.constant 1 : i32
    %0 = arith.muli %arg0, %c1_i32 : i32
    %1 = arith.addi %0, %arg1 : i32
    %c0_i32 = arith.constant 0 : i32
    %c0_i32_0 = arith.constant 0 : i32
    return %c0_i32, %1 : i32, i32
  }
}

</mosaic_0001>

<bundles_post_ra>
// kernel: decoder_forward.1
= control target key start
LH: loop header
LB: loop body
LE: loop exit
PB: predicated region body
PF: predicated region fallthrough
CT: control target
= control target key end

     0   :  { %v3381_v0 = vmov 0   ;;  %v3382_v3 = vmov 1   ;;  %v93_v39 = vlaneseq  ;;  %vm483_vm0 = vcmask 130048   ;;  %s3385_s22 = smov 96   ;;  %s4719_s0 = inlined_call_operand.vmem [shape: s32[256,2], index: 0, kind: input, shape index: {}]   ;;  %s4720_s1 = inlined_call_operand.vmem [shape: f32[16,128], index: 1, kind: input, shape index: {}]   ;;  %s4721_s2 = inlined_call_operand.vmem [shape: f32[16,128], index: 2, kind: input, shape index: {}]   ;;  %s4722_s3 = inlined_call_operand.vmem [shape: f32[1,128], index: 3, kind: input, shape index: {}]   ;;  %s4723_s4 = inlined_call_operand.vmem [shape: f32[8,64], index: 4, kind: input, shape index: {}]   ;;  %s4724_s5 = inlined_call_operand.vmem [shape: f32[8,1], index: 5, kind: input, shape index: {}]   ;;  %s4725_s7 = inlined_call_operand.vmem [shape: f32[8,256], index: 7, kind: output, shape index: {1}]   ;;  %s4726_s6 = inlined_call_operand.vmem [shape: f32[1,16,32], index: 6, kind: output, shape index: {0}]  }
   0x1   :  { %2999 = vset.pattern.permute.xlu1 %v3381_v0  ;;  %2997 = vset.pattern.permute.xlu0 %v3381_v0  ;;  %v62_v1 = vld [vmem:[%s4719_s0 + $0x8] sm:$0xff]  ;;  %v61_v2 = vld [vmem:[%s4719_s0] sm:$0xff]  ;;  %v63_v4 = vld [vmem:[%s4719_s0 + $0x10] sm:$0xff]  ;;  %v3383_v44 = vmov 0.0  }
   0x2   :  { %99 = vperm.xlu1 %2999, %v62_v1   ;;  %96 = vperm.xlu0 %2997, %v61_v2   ;;  %v64_v5 = vld [vmem:[%s4719_s0 + $0x18] sm:$0xff]  ;;  %v479_v6 = vld [vmem:[%s4720_s1] sm:$0xff]  ;;  %v480_v7 = vld [vmem:[%s4720_s1 + $0x8] sm:$0xff]  ;;  %v3537_v41 = vand.u32 127, %v93_v39 }
   0x3   :  { %v481_v8 = vld [vmem:[%s4721_s2] sm:$0xff]  ;;  %v482_v9 = vld [vmem:[%s4721_s2 + $0x8] sm:$0xff]  ;;  %v2876_v10 = vpack.c.bf16 %v480_v7, %v479_v6  ;;  %v67_v14 = vld [vmem:[%s4719_s0 + $0x30] sm:$0xff] }
   0x4   :  { %v2872_v11 = vpack.c.bf16 %v482_v9, %v481_v8  ;;  %v65_v12 = vld [vmem:[%s4719_s0 + $0x20] sm:$0xff]  ;;  %v66_v13 = vld [vmem:[%s4719_s0 + $0x28] sm:$0xff]  ;;  %v68_v15 = vld [vmem:[%s4719_s0 + $0x38] sm:$0xff] }
   0x5   :  { %2877 = vmatprep.subr.bf16.mxu0 %v2876_v10  ;;  %v69_v16 = vld [vmem:[%s4719_s0 + $0x40] sm:$0xff]  ;;  %v70_v17 = vld [vmem:[%s4719_s0 + $0x48] sm:$0xff]  ;;  %v71_v18 = vld [vmem:[%s4719_s0 + $0x50] sm:$0xff] }
   0x6   :  { %3000 = vset.pattern.permute.xlu1 %v3382_v3  ;;  %2998 = vset.pattern.permute.xlu0 %v3382_v3  ;;  %v72_v19 = vld [vmem:[%s4719_s0 + $0x58] sm:$0xff]  ;;  %v73_v20 = vld [vmem:[%s4719_s0 + $0x60] sm:$0xff]  ;;  %v74_v21 = vld [vmem:[%s4719_s0 + $0x68] sm:$0xff] }
   0x7   :  { %291 = vperm.xlu1 %3000, %v62_v1   ;;  %288 = vperm.xlu0 %2998, %v61_v2   ;;  %v75_v22 = vld [vmem:[%s4719_s0 + $0x70] sm:$0xff]  ;;  %v76_v23 = vld [vmem:[%s4719_s0 + $0x78] sm:$0xff]  ;;  %v77_v24 = vld [vmem:[%s4719_s0 + $0x80] sm:$0xff] }
   0x8   :  { %2879 = vmatpush3.bf16.msra.mxu0 %v2876_v10  ;;  %2873 = vmatprep.subr.bf16.mxu1 %v2872_v11  ;;  %v78_v25 = vld [vmem:[%s4719_s0 + $0x88] sm:$0xff]  ;;  %v79_v26 = vld [vmem:[%s4719_s0 + $0x90] sm:$0xff]  ;;  %v80_v27 = vld [vmem:[%s4719_s0 + $0x98] sm:$0xff] }
   0x9   :  { %2875 = vmatpush3.bf16.msra.mxu1 %v2872_v11  ;;  %v81_v28 = vld [vmem:[%s4719_s0 + $0xa0] sm:$0xff]  ;;  %v82_v29 = vld [vmem:[%s4719_s0 + $0xa8] sm:$0xff]  ;;  %v83_v30 = vld [vmem:[%s4719_s0 + $0xb0] sm:$0xff] }
   0xa   :  { %v84_v31 = vld [vmem:[%s4719_s0 + $0xb8] sm:$0xff]  ;;  %v85_v32 = vld [vmem:[%s4719_s0 + $0xc0] sm:$0xff]  ;;  %v86_v33 = vld [vmem:[%s4719_s0 + $0xc8] sm:$0xff] }
   0xb   :  { %3001 = vset.pattern.permute.xlu1 %v3381_v0  ;;  %294 = vperm.xlu0 %2998, %v63_v4   ;;  %v87_v34 = vld [vmem:[%s4719_s0 + $0xd0] sm:$0xff]  ;;  %v88_v35 = vld [vmem:[%s4719_s0 + $0xd8] sm:$0xff]  ;;  %v89_v36 = vld [vmem:[%s4719_s0 + $0xe0] sm:$0xff] }
   0xc   :  { %102 = vperm.xlu1 %3001, %v63_v4   ;;  %v90_v37 = vld [vmem:[%s4719_s0 + $0xe8] sm:$0xff]  ;;  %v91_v38 = vld [vmem:[%s4719_s0 + $0xf0] sm:$0xff]  ;;  %v92_v40 = vld [vmem:[%s4719_s0 + $0xf8] sm:$0xff] }
   0xf   :  { %297 = vperm.xlu0 %2998, %v64_v5  }
  0x10   :  { %105 = vperm.xlu1 %3001, %v64_v5  }
  0x13   :  { %300 = vperm.xlu0 %2998, %v65_v12  }
  0x14   :  { %108 = vperm.xlu1 %3001, %v65_v12  }
  0x17   :  { %303 = vperm.xlu0 %2998, %v66_v13  }
  0x18   :  { %111 = vperm.xlu1 %3001, %v66_v13  }
  0x1b   :  { %306 = vperm.xlu0 %2998, %v67_v14  }
  0x1c   :  { %114 = vperm.xlu1 %3001, %v67_v14  }
  0x1f   :  { %309 = vperm.xlu0 %2998, %v68_v15  }
  0x20   :  { %117 = vperm.xlu1 %3001, %v68_v15  }
  0x23   :  { %312 = vperm.xlu0 %2998, %v69_v16  }
  0x24   :  { %120 = vperm.xlu1 %3001, %v69_v16  }
  0x27   :  { %315 = vperm.xlu0 %2998, %v70_v17  }
  0x28   :  { %123 = vperm.xlu1 %3001, %v70_v17  }
  0x2b   :  { %318 = vperm.xlu0 %2998, %v71_v18  }
  0x2c   :  { %126 = vperm.xlu1 %3001, %v71_v18  }
  0x2f   :  { %321 = vperm.xlu0 %2998, %v72_v19  }
  0x30   :  { %129 = vperm.xlu1 %3001, %v72_v19  }
  0x33   :  { %324 = vperm.xlu0 %2998, %v73_v20  }
  0x34   :  { %132 = vperm.xlu1 %3001, %v73_v20  }
  0x37   :  { %327 = vperm.xlu0 %2998, %v74_v21  }
  0x38   :  { %135 = vperm.xlu1 %3001, %v74_v21  }
  0x3b   :  { %330 = vperm.xlu0 %2998, %v75_v22  }
  0x3c   :  { %138 = vperm.xlu1 %3001, %v75_v22  }
  0x3f   :  { %333 = vperm.xlu0 %2998, %v76_v23  }
  0x40   :  { %141 = vperm.xlu1 %3001, %v76_v23  }
  0x43   :  { %336 = vperm.xlu0 %2998, %v77_v24  }
  0x44   :  { %144 = vperm.xlu1 %3001, %v77_v24  }
  0x47   :  { %339 = vperm.xlu0 %2998, %v78_v25  }
  0x48   :  { %147 = vperm.xlu1 %3001, %v78_v25  }
  0x4b   :  { %342 = vperm.xlu0 %2998, %v79_v26  }
  0x4c   :  { %150 = vperm.xlu1 %3001, %v79_v26  }
  0x4f   :  { %345 = vperm.xlu0 %2998, %v80_v27  }
  0x50   :  { %153 = vperm.xlu1 %3001, %v80_v27  }
  0x53   :  { %348 = vperm.xlu0 %2998, %v81_v28  }
  0x54   :  { %156 = vperm.xlu1 %3001, %v81_v28  }
  0x57   :  { %351 = vperm.xlu0 %2998, %v82_v29  }
  0x58   :  { %159 = vperm.xlu1 %3001, %v82_v29  }
  0x5b   :  { %354 = vperm.xlu0 %2998, %v83_v30  }
  0x5c   :  { %162 = vperm.xlu1 %3001, %v83_v30  }
  0x5f   :  { %357 = vperm.xlu0 %2998, %v84_v31  }
  0x60   :  { %165 = vperm.xlu1 %3001, %v84_v31  }
  0x63   :  { %360 = vperm.xlu0 %2998, %v85_v32  }
  0x64   :  { %168 = vperm.xlu1 %3001, %v85_v32  }
  0x67   :  { %363 = vperm.xlu0 %2998, %v86_v33  }
  0x68   :  { %171 = vperm.xlu1 %3001, %v86_v33  }
  0x6b   :  { %366 = vperm.xlu0 %2998, %v87_v34  }
  0x6c   :  { %174 = vperm.xlu1 %3001, %v87_v34  }
  0x6f   :  { %369 = vperm.xlu0 %2998, %v88_v35  }
  0x70   :  { %177 = vperm.xlu1 %3001, %v88_v35  }
  0x73   :  { %372 = vperm.xlu0 %2998, %v89_v36  }
  0x74   :  { %180 = vperm.xlu1 %3001, %v89_v36  }
  0x77   :  { %375 = vperm.xlu0 %2998, %v90_v37  }
  0x78   :  { %183 = vperm.xlu1 %3001, %v90_v37  }
  0x7b   :  { %378 = vperm.xlu0 %2998, %v91_v38  }
  0x7c   :  { %186 = vperm.xlu1 %3001, %v91_v38  }
  0x7f   :  { %381 = vperm.xlu0 %2998, %v92_v40  }
  0x80   :  { %189 = vperm.xlu1 %3001, %v92_v40  }
  0x81   :  { %v100_v42 = vpop.permute.xlu1 %99  ;;  %v97_v43 = vpop.permute.xlu0 %96 }
  0x82   :  { %vm192_vm1 = vcmp.eq.s32.totalorder %v3537_v41, %v100_v42  ;;  %vm191_vm2 = vcmp.eq.s32.totalorder %v3537_v41, %v97_v43 }
  0x83   :  { %v2435_v45 = vsel %vm192_vm1, 1.0, %v3383_v44  ;;  %v2434_v46 = vsel %vm191_vm2, 1.0, %v3383_v44  ;;  %3124 = vset.pattern.permute.xlu0 %v3381_v0 }
  0x84   :  { %2824 = vmatprep.mubr.msk.f32.mxu0 %vm483_vm0, %v2434_v46 }
  0x85   :  { %2825 = vmatmul.mubr.msk.f32.vlgmr.msra.gmra.mrb[0].mxu0 %vm483_vm0, %v2435_v45 }
  0x86   :  { %v292_v47 = vpop.permute.xlu1 %291  ;;  %v289_v48 = vpop.permute.xlu0 %288 }
  0x87   :  { %vm384_vm3 = vcmp.eq.s32.totalorder %v3537_v41, %v292_v47  ;;  %vm383_vm4 = vcmp.eq.s32.totalorder %v3537_v41, %v289_v48 }
  0x88   :  { %v3549_v49 = vsel %vm384_vm3, 1.0, %v3383_v44  ;;  %v3552_v50 = vsel %vm383_vm4, 1.0, %v3383_v44 }
  0x89   :  { %4787 = vst [vmem:[#allocation2_spill] sm:$0xff] %v3549_v49  ;;  %4788 = vst [vmem:[#allocation3_spill] sm:$0xff] %v3552_v50  ;;  %2772 = vmatprep.mubr.msk.f32.mxu1 %vm483_vm0, %v3552_v50 }
  0x8a   :  { %2773 = vmatmul.mubr.msk.f32.vlgmr.msra.gmra.mrb[0].mxu1 %vm483_vm0, %v3549_v49  ;;  %v295_v51 = vpop.permute.xlu0 %294 }
  0x8b   :  { %vm385_vm5 = vcmp.eq.s32.totalorder %v3537_v41, %v295_v51  ;;  %v103_v52 = vpop.permute.xlu1 %102 }
  0x8c   :  { %v3560_v53 = vsel %vm385_vm5, 1.0, %v3383_v44  ;;  %vm193_vm6 = vcmp.eq.s32.totalorder %v3537_v41, %v103_v52 }
  0x8d   :  { %4789 = vst [vmem:[#allocation4_spill] sm:$0xff] %v3560_v53  ;;  %v2436_v54 = vsel %vm193_vm6, 1.0, %v3383_v44  ;;  %2775 = vmatprep.mubr.msk.f32.mxu1 %vm483_vm0, %v3560_v53 }
  0x8e   :  { %2827 = vmatprep.mubr.msk.f32.mxu0 %vm483_vm0, %v2436_v54  ;;  %v298_v55 = vpop.permute.xlu0 %297 }
  0x8f   :  { %vm386_vm7 = vcmp.eq.s32.totalorder %v3537_v41, %v298_v55  ;;  %v106_v56 = vpop.permute.xlu1 %105 }
  0x90   :  { %v3569_v57 = vsel %vm386_vm7, 1.0, %v3383_v44  ;;  %vm194_vm8 = vcmp.eq.s32.totalorder %v3537_v41, %v106_v56 }
  0x91   :  { %4790 = vst [vmem:[#allocation5_spill] sm:$0xff] %v3569_v57  ;;  %v2437_v58 = vsel %vm194_vm8, 1.0, %v3383_v44  ;;  %2776 = vmatmul.mubr.msk.f32.gmra.mrb[2].mxu1 %vm483_vm0, %v3569_v57 }
  0x92   :  { %2828 = vmatmul.mubr.msk.f32.gmra.mrb[2].mxu0 %vm483_vm0, %v2437_v58  ;;  %v301_v59 = vpop.permute.xlu0 %300 }
  0x93   :  { %vm387_vm9 = vcmp.eq.s32.totalorder %v3537_v41, %v301_v59  ;;  %v109_v60 = vpop.permute.xlu1 %108 }
  0x94   :  { %v3578_v61 = vsel %vm387_vm9, 1.0, %v3383_v44  ;;  %vm195_vm10 = vcmp.eq.s32.totalorder %v3537_v41, %v109_v60 }
  0x95   :  { %4791 = vst [vmem:[#allocation6_spill] sm:$0xff] %v3578_v61  ;;  %v2438_v62 = vsel %vm195_vm10, 1.0, %v3383_v44  ;;  %2778 = vmatprep.mubr.msk.f32.mxu1 %vm483_vm0, %v3578_v61 }
  0x96   :  { %2830 = vmatprep.mubr.msk.f32.mxu0 %vm483_vm0, %v2438_v62  ;;  %v304_v63 = vpop.permute.xlu0 %303 }
  0x97   :  { %vm388_vm11 = vcmp.eq.s32.totalorder %v3537_v41, %v304_v63  ;;  %v112_v0 = vpop.permute.xlu1 %111 }
  0x98   :  { %v3587_v1 = vsel %vm388_vm11, 1.0, %v3383_v44  ;;  %vm196_vm12 = vcmp.eq.s32.totalorder %v3537_v41, %v112_v0 }
  0x99   :  { %4792 = vst [vmem:[#allocation7_spill] sm:$0xff] %v3587_v1  ;;  %v2439_v2 = vsel %vm196_vm12, 1.0, %v3383_v44  ;;  %2779 = vmatmul.mubr.msk.f32.gmra.mrb[4].mxu1 %vm483_vm0, %v3587_v1 }
  0x9a   :  { %2831 = vmatmul.mubr.msk.f32.gmra.mrb[4].mxu0 %vm483_vm0, %v2439_v2  ;;  %v307_v3 = vpop.permute.xlu0 %306 }
  0x9b   :  { %vm389_vm13 = vcmp.eq.s32.totalorder %v3537_v41, %v307_v3  ;;  %v115_v4 = vpop.permute.xlu1 %114 }
  0x9c   :  { %v3596_v5 = vsel %vm389_vm13, 1.0, %v3383_v44  ;;  %vm197_vm14 = vcmp.eq.s32.totalorder %v3537_v41, %v115_v4 }
  0x9d   :  { %4793 = vst [vmem:[#allocation8_spill] sm:$0xff] %v3596_v5  ;;  %v2440_v6 = vsel %vm197_vm14, 1.0, %v3383_v44  ;;  %2781 = vmatprep.mubr.msk.f32.mxu1 %vm483_vm0, %v3596_v5 }
  0x9e   :  { %2833 = vmatprep.mubr.msk.f32.mxu0 %vm483_vm0, %v2440_v6  ;;  %v310_v7 = vpop.permute.xlu0 %309 }
  0x9f   :  { %vm390_vm15 = vcmp.eq.s32.totalorder %v3537_v41, %v310_v7  ;;  %v118_v8 = vpop.permute.xlu1 %117 }
  0xa0   :  { %v3605_v9 = vsel %vm390_vm15, 1.0, %v3383_v44  ;;  %vm198_vm1 = vcmp.eq.s32.totalorder %v3537_v41, %v118_v8 }
  0xa1   :  { %4794 = vst [vmem:[#allocation9_spill] sm:$0xff] %v3605_v9  ;;  %v2441_v10 = vsel %vm198_vm1, 1.0, %v3383_v44  ;;  %2782 = vmatmul.mubr.msk.f32.gmra.mrb[6].mxu1 %vm483_vm0, %v3605_v9 }
  0xa2   :  { %2834 = vmatmul.mubr.msk.f32.gmra.mrb[6].mxu0 %vm483_vm0, %v2441_v10  ;;  %v313_v11 = vpop.permute.xlu0 %312 }
  0xa3   :  { %vm391_vm2 = vcmp.eq.s32.totalorder %v3537_v41, %v313_v11  ;;  %v121_v12 = vpop.permute.xlu1 %120 }
  0xa4   :  { %v3614_v13 = vsel %vm391_vm2, 1.0, %v3383_v44  ;;  %vm199_vm3 = vcmp.eq.s32.totalorder %v3537_v41, %v121_v12 }
  0xa5   :  { %4795 = vst [vmem:[#allocation10_spill] sm:$0xff] %v3614_v13  ;;  %v2442_v14 = vsel %vm199_vm3, 1.0, %v3383_v44  ;;  %2784 = vmatprep.mubr.msk.f32.mxu1 %vm483_vm0, %v3614_v13 }
  0xa6   :  { %2836 = vmatprep.mubr.msk.f32.mxu0 %vm483_vm0, %v2442_v14  ;;  %v316_v15 = vpop.permute.xlu0 %315 }
  0xa7   :  { %vm392_vm4 = vcmp.eq.s32.totalorder %v3537_v41, %v316_v15  ;;  %v124_v16 = vpop.permute.xlu1 %123 }
  0xa8   :  { %v3623_v17 = vsel %vm392_vm4, 1.0, %v3383_v44  ;;  %vm200_vm5 = vcmp.eq.s32.totalorder %v3537_v41, %v124_v16 }
  0xa9   :  { %4796 = vst [vmem:[#allocation11_spill] sm:$0xff] %v3623_v17  ;;  %v2443_v18 = vsel %vm200_vm5, 1.0, %v3383_v44  ;;  %2785 = vmatmul.mubr.msk.f32.gmra.mrb[8].mxu1 %vm483_vm0, %v3623_v17 }
  0xaa   :  { %2837 = vmatmul.mubr.msk.f32.gmra.mrb[8].mxu0 %vm483_vm0, %v2443_v18  ;;  %v319_v19 = vpop.permute.xlu0 %318 }
  0xab   :  { %vm393_vm6 = vcmp.eq.s32.totalorder %v3537_v41, %v319_v19  ;;  %v127_v20 = vpop.permute.xlu1 %126 }
  0xac   :  { %v3632_v21 = vsel %vm393_vm6, 1.0, %v3383_v44  ;;  %vm201_vm7 = vcmp.eq.s32.totalorder %v3537_v41, %v127_v20 }
  0xad   :  { %4797 = vst [vmem:[#allocation12_spill] sm:$0xff] %v3632_v21  ;;  %v2444_v22 = vsel %vm201_vm7, 1.0, %v3383_v44  ;;  %2787 = vmatprep.mubr.msk.f32.mxu1 %vm483_vm0, %v3632_v21 }
  0xae   :  { %2839 = vmatprep.mubr.msk.f32.mxu0 %vm483_vm0, %v2444_v22  ;;  %v322_v23 = vpop.permute.xlu0 %321 }
  0xaf   :  { %vm394_vm8 = vcmp.eq.s32.totalorder %v3537_v41, %v322_v23  ;;  %v130_v24 = vpop.permute.xlu1 %129 }
  0xb0   :  { %v3641_v25 = vsel %vm394_vm8, 1.0, %v3383_v44  ;;  %vm202_vm9 = vcmp.eq.s32.totalorder %v3537_v41, %v130_v24 }
  0xb1   :  { %4798 = vst [vmem:[#allocation13_spill] sm:$0xff] %v3641_v25  ;;  %v2445_v26 = vsel %vm202_vm9, 1.0, %v3383_v44  ;;  %2788 = vmatmul.mubr.msk.f32.gmra.mrb[10].mxu1 %vm483_vm0, %v3641_v25 }
  0xb2   :  { %2840 = vmatmul.mubr.msk.f32.gmra.mrb[10].mxu0 %vm483_vm0, %v2445_v26  ;;  %v325_v27 = vpop.permute.xlu0 %324 }
  0xb3   :  { %vm395_vm10 = vcmp.eq.s32.totalorder %v3537_v41, %v325_v27  ;;  %v133_v28 = vpop.permute.xlu1 %132 }
  0xb4   :  { %v3650_v29 = vsel %vm395_vm10, 1.0, %v3383_v44  ;;  %vm203_vm11 = vcmp.eq.s32.totalorder %v3537_v41, %v133_v28 }
  0xb5   :  { %4799 = vst [vmem:[#allocation14_spill] sm:$0xff] %v3650_v29  ;;  %v2446_v30 = vsel %vm203_vm11, 1.0, %v3383_v44  ;;  %2790 = vmatprep.mubr.msk.f32.mxu1 %vm483_vm0, %v3650_v29 }
  0xb6   :  { %2842 = vmatprep.mubr.msk.f32.mxu0 %vm483_vm0, %v2446_v30  ;;  %v328_v31 = vpop.permute.xlu0 %327 }
  0xb7   :  { %vm396_vm12 = vcmp.eq.s32.totalorder %v3537_v41, %v328_v31  ;;  %v136_v32 = vpop.permute.xlu1 %135 }
  0xb8   :  { %v3659_v33 = vsel %vm396_vm12, 1.0, %v3383_v44  ;;  %vm204_vm13 = vcmp.eq.s32.totalorder %v3537_v41, %v136_v32 }
  0xb9   :  { %4800 = vst [vmem:[#allocation15_spill] sm:$0xff] %v3659_v33  ;;  %v2447_v34 = vsel %vm204_vm13, 1.0, %v3383_v44  ;;  %2791 = vmatmul.mubr.msk.f32.gmra.mrb[12].mxu1 %vm483_vm0, %v3659_v33 }
  0xba   :  { %2843 = vmatmul.mubr.msk.f32.gmra.mrb[12].mxu0 %vm483_vm0, %v2447_v34  ;;  %v331_v35 = vpop.permute.xlu0 %330 }
  0xbb   :  { %vm397_vm14 = vcmp.eq.s32.totalorder %v3537_v41, %v331_v35  ;;  %v139_v36 = vpop.permute.xlu1 %138 }
  0xbc   :  { %v3668_v37 = vsel %vm397_vm14, 1.0, %v3383_v44  ;;  %vm205_vm15 = vcmp.eq.s32.totalorder %v3537_v41, %v139_v36 }
  0xbd   :  { %4801 = vst [vmem:[#allocation16_spill] sm:$0xff] %v3668_v37  ;;  %v2448_v38 = vsel %vm205_vm15, 1.0, %v3383_v44  ;;  %2793 = vmatprep.mubr.msk.f32.mxu1 %vm483_vm0, %v3668_v37 }
  0xbe   :  { %2845 = vmatprep.mubr.msk.f32.mxu0 %vm483_vm0, %v2448_v38  ;;  %v334_v39 = vpop.permute.xlu0 %333 }
  0xbf   :  { %vm398_vm1 = vcmp.eq.s32.totalorder %v3537_v41, %v334_v39  ;;  %v142_v40 = vpop.permute.xlu1 %141 }
  0xc0   :  { %v3677_v42 = vsel %vm398_vm1, 1.0, %v3383_v44  ;;  %vm206_vm2 = vcmp.eq.s32.totalorder %v3537_v41, %v142_v40 }
  0xc1   :  { %4802 = vst [vmem:[#allocation17_spill] sm:$0xff] %v3677_v42  ;;  %v2449_v43 = vsel %vm206_vm2, 1.0, %v3383_v44  ;;  %2794 = vmatmul.mubr.msk.f32.gmra.mrb[14].mxu1 %vm483_vm0, %v3677_v42 }
  0xc2   :  { %2846 = vmatmul.mubr.msk.f32.gmra.mrb[14].mxu0 %vm483_vm0, %v2449_v43  ;;  %v337_v45 = vpop.permute.xlu0 %336 }
  0xc3   :  { %vm399_vm3 = vcmp.eq.s32.totalorder %v3537_v41, %v337_v45  ;;  %v145_v46 = vpop.permute.xlu1 %144 }
  0xc4   :  { %v3686_v47 = vsel %vm399_vm3, 1.0, %v3383_v44  ;;  %vm207_vm4 = vcmp.eq.s32.totalorder %v3537_v41, %v145_v46 }
  0xc5   :  { %4803 = vst [vmem:[#allocation18_spill] sm:$0xff] %v3686_v47  ;;  %v2450_v51 = vsel %vm207_vm4, 1.0, %v3383_v44  ;;  %2796 = vmatprep.mubr.msk.f32.mxu1 %vm483_vm0, %v3686_v47 }
  0xc6   :  { %2848 = vmatprep.mubr.msk.f32.mxu0 %vm483_vm0, %v2450_v51  ;;  %v340_v52 = vpop.permute.xlu0 %339 }
  0xc7   :  { %vm400_vm5 = vcmp.eq.s32.totalorder %v3537_v41, %v340_v52  ;;  %v148_v54 = vpop.permute.xlu1 %147 }
  0xc8   :  { %v3697_v55 = vsel %vm400_vm5, 1.0, %v3383_v44  ;;  %vm208_vm6 = vcmp.eq.s32.totalorder %v3537_v41, %v148_v54 }
  0xc9   :  { %4804 = vst [vmem:[#allocation19_spill] sm:$0xff] %v3697_v55  ;;  %v2451_v58 = vsel %vm208_vm6, 1.0, %v3383_v44  ;;  %2797 = vmatmul.mubr.msk.f32.gmra.mrb[16].mxu1 %vm483_vm0, %v3697_v55 }
  0xca   :  { %2849 = vmatmul.mubr.msk.f32.gmra.mrb[16].mxu0 %vm483_vm0, %v2451_v58  ;;  %v343_v59 = vpop.permute.xlu0 %342 }
  0xcb   :  { %vm401_vm7 = vcmp.eq.s32.totalorder %v3537_v41, %v343_v59  ;;  %v151_v60 = vpop.permute.xlu1 %150 }
  0xcc   :  { %v3708_v62 = vsel %vm401_vm7, 1.0, %v3383_v44  ;;  %vm209_vm8 = vcmp.eq.s32.totalorder %v3537_v41, %v151_v60 }
  0xcd   :  { %4805 = vst [vmem:[#allocation20_spill] sm:$0xff] %v3708_v62  ;;  %v2452_v0 = vsel %vm209_vm8, 1.0, %v3383_v44  ;;  %2799 = vmatprep.mubr.msk.f32.mxu1 %vm483_vm0, %v3708_v62 }
  0xce   :  { %2851 = vmatprep.mubr.msk.f32.mxu0 %vm483_vm0, %v2452_v0  ;;  %v346_v2 = vpop.permute.xlu0 %345 }
  0xcf   :  { %vm402_vm9 = vcmp.eq.s32.totalorder %v3537_v41, %v346_v2  ;;  %v154_v3 = vpop.permute.xlu1 %153 }
  0xd0   :  { %v3719_v4 = vsel %vm402_vm9, 1.0, %v3383_v44  ;;  %vm210_vm10 = vcmp.eq.s32.totalorder %v3537_v41, %v154_v3 }
  0xd1   :  { %4806 = vst [vmem:[#allocation21_spill] sm:$0xff] %v3719_v4  ;;  %v2453_v7 = vsel %vm210_vm10, 1.0, %v3383_v44  ;;  %2800 = vmatmul.mubr.msk.f32.gmra.mrb[18].mxu1 %vm483_vm0, %v3719_v4 }
  0xd2   :  { %2852 = vmatmul.mubr.msk.f32.gmra.mrb[18].mxu0 %vm483_vm0, %v2453_v7  ;;  %v349_v8 = vpop.permute.xlu0 %348 }
  0xd3   :  { %vm403_vm11 = vcmp.eq.s32.totalorder %v3537_v41, %v349_v8  ;;  %v157_v10 = vpop.permute.xlu1 %156 }
  0xd4   :  { %v3730_v11 = vsel %vm403_vm11, 1.0, %v3383_v44  ;;  %vm211_vm12 = vcmp.eq.s32.totalorder %v3537_v41, %v157_v10 }
  0xd5   :  { %4807 = vst [vmem:[#allocation22_spill] sm:$0xff] %v3730_v11  ;;  %v2454_v14 = vsel %vm211_vm12, 1.0, %v3383_v44  ;;  %2802 = vmatprep.mubr.msk.f32.mxu1 %vm483_vm0, %v3730_v11 }
  0xd6   :  { %2854 = vmatprep.mubr.msk.f32.mxu0 %vm483_vm0, %v2454_v14  ;;  %v352_v15 = vpop.permute.xlu0 %351 }
  0xd7   :  { %vm404_vm13 = vcmp.eq.s32.totalorder %v3537_v41, %v352_v15  ;;  %v160_v16 = vpop.permute.xlu1 %159 }
  0xd8   :  { %v3741_v18 = vsel %vm404_vm13, 1.0, %v3383_v44  ;;  %vm212_vm14 = vcmp.eq.s32.totalorder %v3537_v41, %v160_v16 }
  0xd9   :  { %4808 = vst [vmem:[#allocation23_spill] sm:$0xff] %v3741_v18  ;;  %v2455_v20 = vsel %vm212_vm14, 1.0, %v3383_v44  ;;  %2803 = vmatmul.mubr.msk.f32.gmra.mrb[20].mxu1 %vm483_vm0, %v3741_v18 }
  0xda   :  { %2855 = vmatmul.mubr.msk.f32.gmra.mrb[20].mxu0 %vm483_vm0, %v2455_v20  ;;  %v355_v22 = vpop.permute.xlu0 %354 }
  0xdb   :  { %vm405_vm15 = vcmp.eq.s32.totalorder %v3537_v41, %v355_v22  ;;  %v163_v23 = vpop.permute.xlu1 %162 }
  0xdc   :  { %v3752_v24 = vsel %vm405_vm15, 1.0, %v3383_v44  ;;  %vm213_vm1 = vcmp.eq.s32.totalorder %v3537_v41, %v163_v23 }
  0xdd   :  { %4809 = vst [vmem:[#allocation24_spill] sm:$0xff] %v3752_v24  ;;  %v2456_v27 = vsel %vm213_vm1, 1.0, %v3383_v44  ;;  %2805 = vmatprep.mubr.msk.f32.mxu1 %vm483_vm0, %v3752_v24 }
  0xde   :  { %2857 = vmatprep.mubr.msk.f32.mxu0 %vm483_vm0, %v2456_v27  ;;  %v358_v28 = vpop.permute.xlu0 %357 }
  0xdf   :  { %vm406_vm2 = vcmp.eq.s32.totalorder %v3537_v41, %v358_v28  ;;  %v166_v30 = vpop.permute.xlu1 %165 }
  0xe0   :  { %v3763_v31 = vsel %vm406_vm2, 1.0, %v3383_v44  ;;  %vm214_vm3 = vcmp.eq.s32.totalorder %v3537_v41, %v166_v30 }
  0xe1   :  { %4810 = vst [vmem:[#allocation25_spill] sm:$0xff] %v3763_v31  ;;  %v2457_v34 = vsel %vm214_vm3, 1.0, %v3383_v44  ;;  %2806 = vmatmul.mubr.msk.f32.gmra.mrb[22].mxu1 %vm483_vm0, %v3763_v31 }
  0xe2   :  { %2858 = vmatmul.mubr.msk.f32.gmra.mrb[22].mxu0 %vm483_vm0, %v2457_v34  ;;  %v361_v35 = vpop.permute.xlu0 %360 }
  0xe3   :  { %vm407_vm4 = vcmp.eq.s32.totalorder %v3537_v41, %v361_v35  ;;  %v169_v36 = vpop.permute.xlu1 %168 }
  0xe4   :  { %v3774_v38 = vsel %vm407_vm4, 1.0, %v3383_v44  ;;  %vm215_vm5 = vcmp.eq.s32.totalorder %v3537_v41, %v169_v36 }
  0xe5   :  { %4811 = vst [vmem:[#allocation26_spill] sm:$0xff] %v3774_v38  ;;  %v2458_v40 = vsel %vm215_vm5, 1.0, %v3383_v44  ;;  %2808 = vmatprep.mubr.msk.f32.mxu1 %vm483_vm0, %v3774_v38 }
  0xe6   :  { %2860 = vmatprep.mubr.msk.f32.mxu0 %vm483_vm0, %v2458_v40  ;;  %v364_v43 = vpop.permute.xlu0 %363 }
  0xe7   :  { %vm408_vm6 = vcmp.eq.s32.totalorder %v3537_v41, %v364_v43  ;;  %v172_v45 = vpop.permute.xlu1 %171 }
  0xe8   :  { %v3785_v46 = vsel %vm408_vm6, 1.0, %v3383_v44  ;;  %vm216_vm7 = vcmp.eq.s32.totalorder %v3537_v41, %v172_v45 }
  0xe9   :  { %4812 = vst [vmem:[#allocation27_spill] sm:$0xff] %v3785_v46  ;;  %v2459_v52 = vsel %vm216_vm7, 1.0, %v3383_v44  ;;  %2809 = vmatmul.mubr.msk.f32.gmra.mrb[24].mxu1 %vm483_vm0, %v3785_v46 }
  0xea   :  { %2861 = vmatmul.mubr.msk.f32.gmra.mrb[24].mxu0 %vm483_vm0, %v2459_v52  ;;  %v367_v54 = vpop.permute.xlu0 %366 }
  0xeb   :  { %vm409_vm8 = vcmp.eq.s32.totalorder %v3537_v41, %v367_v54  ;;  %v175_v58 = vpop.permute.xlu1 %174 }
  0xec   :  { %v3796_v59 = vsel %vm409_vm8, 1.0, %v3383_v44  ;;  %vm217_vm9 = vcmp.eq.s32.totalorder %v3537_v41, %v175_v58 }
  0xed   :  { %4813 = vst [vmem:[#allocation28_spill] sm:$0xff] %v3796_v59  ;;  %v2460_v0 = vsel %vm217_vm9, 1.0, %v3383_v44  ;;  %2811 = vmatprep.mubr.msk.f32.mxu1 %vm483_vm0, %v3796_v59 }
  0xee   :  { %2863 = vmatprep.mubr.msk.f32.mxu0 %vm483_vm0, %v2460_v0  ;;  %v370_v2 = vpop.permute.xlu0 %369 }
  0xef   :  { %vm410_vm10 = vcmp.eq.s32.totalorder %v3537_v41, %v370_v2  ;;  %v178_v3 = vpop.permute.xlu1 %177 }
  0xf0   :  { %v3807_v7 = vsel %vm410_vm10, 1.0, %v3383_v44  ;;  %vm218_vm11 = vcmp.eq.s32.totalorder %v3537_v41, %v178_v3 }
  0xf1   :  { %4814 = vst [vmem:[#allocation29_spill] sm:$0xff] %v3807_v7  ;;  %v2461_v10 = vsel %vm218_vm11, 1.0, %v3383_v44  ;;  %2812 = vmatmul.mubr.msk.f32.gmra.mrb[26].mxu1 %vm483_vm0, %v3807_v7 }
  0xf2   :  { %2864 = vmatmul.mubr.msk.f32.gmra.mrb[26].mxu0 %vm483_vm0, %v2461_v10  ;;  %v373_v14 = vpop.permute.xlu0 %372 }
  0xf3   :  { %vm411_vm12 = vcmp.eq.s32.totalorder %v3537_v41, %v373_v14  ;;  %v181_v15 = vpop.permute.xlu1 %180 }
  0xf4   :  { %v3818_v16 = vsel %vm411_vm12, 1.0, %v3383_v44  ;;  %vm219_vm13 = vcmp.eq.s32.totalorder %v3537_v41, %v181_v15  ;;  %v3863_v15 = vld [vmem:[%s4722_s3] ss:$0 sm:$0xff]  ;;  %s3384_s3 = smov 64  }
  0xf5   :  { %4815 = vst [vmem:[#allocation30_spill] sm:$0xff] %v3818_v16  ;;  %v2462_v22 = vsel %vm219_vm13, 1.0, %v3383_v44  ;;  %2814 = vmatprep.mubr.msk.f32.mxu1 %vm483_vm0, %v3818_v16 }
  0xf6   :  { %2866 = vmatprep.mubr.msk.f32.mxu0 %vm483_vm0, %v2462_v22  ;;  %v376_v23 = vpop.permute.xlu0 %375 }
  0xf7   :  { %vm412_vm14 = vcmp.eq.s32.totalorder %v3537_v41, %v376_v23  ;;  %v184_v27 = vpop.permute.xlu1 %183 }
  0xf8   :  { %v3829_v28 = vsel %vm412_vm14, 1.0, %v3383_v44  ;;  %vm220_vm15 = vcmp.eq.s32.totalorder %v3537_v41, %v184_v27 }
  0xf9   :  { %4816 = vst [vmem:[#allocation31_spill] sm:$0xff] %v3829_v28  ;;  %v2463_v34 = vsel %vm220_vm15, 1.0, %v3383_v44  ;;  %2815 = vmatmul.mubr.msk.f32.gmra.mrb[28].mxu1 %vm483_vm0, %v3829_v28 }
  0xfa   :  { %2867 = vmatmul.mubr.msk.f32.gmra.mrb[28].mxu0 %vm483_vm0, %v2463_v34  ;;  %v379_v35 = vpop.permute.xlu0 %378 }
  0xfb   :  { %vm413_vm1 = vcmp.eq.s32.totalorder %v3537_v41, %v379_v35  ;;  %v187_v36 = vpop.permute.xlu1 %186 }
  0xfc   :  { %v3840_v40 = vsel %vm413_vm1, 1.0, %v3383_v44  ;;  %vm221_vm2 = vcmp.eq.s32.totalorder %v3537_v41, %v187_v36 }
  0xfd   :  { %4817 = vst [vmem:[#allocation32_spill] sm:$0xff] %v3840_v40  ;;  %v2464_v45 = vsel %vm221_vm2, 1.0, %v3383_v44  ;;  %2817 = vmatprep.mubr.msk.f32.mxu1 %vm483_vm0, %v3840_v40 }
  0xfe   :  { %2869 = vmatprep.mubr.msk.f32.mxu0 %vm483_vm0, %v2464_v45  ;;  %v382_v52 = vpop.permute.xlu0 %381 }
  0xff   :  { %vm414_vm3 = vcmp.eq.s32.totalorder %v3537_v41, %v382_v52  ;;  %v190_v54 = vpop.permute.xlu1 %189 }
 0x100   :  { %v3851_v58 = vsel %vm414_vm3, 1.0, %v3383_v44  ;;  %vm222_vm4 = vcmp.eq.s32.totalorder %v3537_v41, %v190_v54 }
 0x101   :  { %4818 = vst [vmem:[#allocation33_spill] sm:$0xff] %v3851_v58  ;;  %v2465_v2 = vsel %vm222_vm4, 1.0, %v3383_v44  ;;  %2818 = vmatmul.mubr.msk.f32.gmra.mrb[30].mxu1 %vm483_vm0, %v3851_v58 }
 0x102   :  { %2870 = vmatmul.mubr.msk.f32.gmra.mrb[30].mxu0 %vm483_vm0, %v2465_v2 }
 0x158   :  { %v2826_v3 = vpop.f32.mrb[0].mxu0 }
 0x159   :  { %v967_v10 = vpop.f32.mrb[1].mxu0 }
 0x15d   :  { %v2774_v14 = vpop.f32.mrb[0].mxu1 }
 0x15e   :  { %v973_v22 = vadd.f32 %v2826_v3, %v2774_v14  ;;  %v646_v41 = vpop.f32.mrb[1].mxu1 }
 0x15f   :  { %v968_v23 = vadd.f32 %v967_v10, %v646_v41 }
 0x160   :  { %v3866_v27 = vadd.f32 %v3863_v15, %v973_v22 }
 0x161   :  { %v3869_v44 = vadd.f32 %v3863_v15, %v968_v23 }
 0x162   :  { %v4734_v34 = vmax.f32 %v3866_v27, 0.0  ;;  %v1634_v10 = vand.u32 2147483647, %v3866_v27 }
 0x163   :  { %v4730_v35 = vmax.f32 %v3869_v44, 0.0  ;;  %v1633_v48 = vand.u32 2147483647, %v3869_v44  ;;  %v2596_v13 = vmul.f32 -1.442695, %v3869_v44 }
 0x164   :  { %v2777_v36 = vpop.f32.mrb[2].mxu1  ;;  %v1666_v0 = vsub.f32 0.0, %v1634_v10 }
 0x165   :  { %v656_v45 = vpop.f32.mrb[3].mxu1  ;;  %v2829_v52 = vpop.f32.mrb[2].mxu0  ;;  %v3002_v54 = vpack.i.bf16 %v4734_v34, %v4730_v35 }
 0x166   :  { %v983_v2 = vadd.f32 %v2829_v52, %v2777_v36  ;;  %v977_v3 = vpop.f32.mrb[3].mxu0 }
 0x167   :  { %v978_v14 = vadd.f32 %v977_v3, %v656_v45  ;;  %3003 = vrot.lane.b32.xlu0 %v3002_v54, %s3384_s3  ;;  %v1699_v3 = vmul.f32 1.442695, %v1666_v0 }
 0x168   :  { %v3880_v22 = vadd.f32 %v3863_v15, %v983_v2 }
 0x169   :  { %v3883_v41 = vadd.f32 %v3863_v15, %v978_v14  ;;  %3125 = vpow2.f32 %v1699_v3 }
 0x16a   :  { %v4733_v23 = vmax.f32 %v3880_v22, 0.0  ;;  %v1636_v36 = vand.u32 2147483647, %v3880_v22 }
 0x16b   :  { %v4729_v43 = vmax.f32 %v3883_v41, 0.0 }
 0x16c   :  { %v2780_v52 = vpop.f32.mrb[4].mxu1  ;;  %v1668_v8 = vsub.f32 0.0, %v1636_v36 }
 0x16d   :  { %v666_v30 = vpop.f32.mrb[5].mxu1  ;;  %v2832_v20 = vpop.f32.mrb[4].mxu0  ;;  %v3007_v45 = vpack.i.bf16 %v4733_v23, %v4729_v43  ;;  %v1665_v43 = vsub.f32 0.0, %v1633_v48 }
 0x16e   :  { %v993_v54 = vadd.f32 %v2832_v20, %v2780_v52  ;;  %v987_v2 = vpop.f32.mrb[5].mxu0  ;;  %v1703_v20 = vmul.f32 1.442695, %v1668_v8 }
 0x16f   :  { %v988_v14 = vadd.f32 %v987_v2, %v666_v30  ;;  %3008 = vrot.lane.b32.xlu0 %v3007_v45, %s3384_s3  ;;  %v1697_v34 = vmul.f32 1.442695, %v1665_v43 }
 0x170   :  { %v3894_v10 = vadd.f32 %v3863_v15, %v993_v54  ;;  %3127 = vpow2.f32 %v1703_v20 }
 0x171   :  { %v3897_v60 = vadd.f32 %v3863_v15, %v988_v14 }
 0x172   :  { %v1638_v51 = vand.u32 2147483647, %v3894_v10  ;;  %v4732_v39 = vmax.f32 %v3894_v10, 0.0 }
 0x173   :  { %v4728_v32 = vmax.f32 %v3897_v60, 0.0 }
 0x174   :  { %v1670_v52 = vsub.f32 0.0, %v1638_v51  ;;  %v2783_v0 = vpop.f32.mrb[6].mxu1 }
 0x175   :  { %v676_v30 = vpop.f32.mrb[7].mxu1  ;;  %v2835_v2 = vpop.f32.mrb[6].mxu0  ;;  %v3012_v36 = vpack.i.bf16 %v4732_v39, %v4728_v32 }
 0x176   :  { %v1003_v45 = vadd.f32 %v2835_v2, %v2783_v0  ;;  %v997_v54 = vpop.f32.mrb[7].mxu0  ;;  %v1707_v14 = vmul.f32 1.442695, %v1670_v52  ;;  %v3916_v2 = vpop.eup %3125 }
 0x177   :  { %v998_v26 = vadd.f32 %v997_v54, %v676_v30  ;;  %3013 = vrot.lane.b32.xlu0 %v3012_v36, %s3384_s3  ;;  %v1770_v6 = vadd.f32 1.0, %v3916_v2 }
 0x178   :  { %v3908_v3 = vadd.f32 %v3863_v15, %v1003_v45  ;;  %3129 = vpow2.f32 %v1707_v14 }
 0x179   :  { %v3911_v51 = vadd.f32 %v3863_v15, %v998_v26  ;;  %3131 = vlog2.f32 %v1770_v6 }
 0x17a   :  { %v1640_v8 = vand.u32 2147483647, %v3908_v3  ;;  %v4731_v19 = vmax.f32 %v3908_v3, 0.0  ;;  %v3930_v56 = vpop.eup %3127 }
 0x17b   :  { %v4727_v12 = vmax.f32 %v3911_v51, 0.0  ;;  %v1788_v32 = vadd.f32 1.0, %v3930_v56  ;;  %v4837_v49 = vmax.f32 %v3911_v51, 0.0 }
 0x17c   :  { %v2786_v0 = vpop.f32.mrb[8].mxu1  ;;  %v1672_v52 = vsub.f32 0.0, %v1640_v8 }
 0x17d   :  { %v686_v30 = vpop.f32.mrb[9].mxu1  ;;  %v2838_v36 = vpop.f32.mrb[8].mxu0  ;;  %v3017_v20 = vpack.i.bf16 %v4731_v19, %v4727_v12 }
 0x17e   :  { %v1013_v26 = vadd.f32 %v2838_v36, %v2786_v0  ;;  %v1007_v45 = vpop.f32.mrb[9].mxu0  ;;  %v1711_v63 = vmul.f32 1.442695, %v1672_v52 }
 0x17f   :  { %v1008_v54 = vadd.f32 %v1007_v45, %v686_v30  ;;  %3018 = vrot.lane.b32.xlu0 %v3017_v20, %s3384_s3 }
 0x180   :  { %v3924_v14 = vadd.f32 %v3863_v15, %v1013_v26  ;;  %3133 = vpow2.f32 %v1711_v63 }
 0x181   :  { %v3928_v8 = vadd.f32 %v3863_v15, %v1008_v54  ;;  %3135 = vlog2.f32 %v1788_v32 }
 0x182   :  { %v1642_v12 = vand.u32 2147483647, %v3924_v14  ;;  %v4736_v0 = vmax.f32 %v3924_v14, 0.0  ;;  %v3936_v20 = vpop.eup %3129 }
 0x183   :  { %v4735_v30 = vmax.f32 %v3928_v8, 0.0  ;;  %v1806_v63 = vadd.f32 1.0, %v3936_v20 }
 0x184   :  { %v2789_v36 = vpop.f32.mrb[10].mxu1  ;;  %v1674_v26 = vsub.f32 0.0, %v1642_v12 }
 0x185   :  { %v696_v52 = vpop.f32.mrb[11].mxu1  ;;  %v2841_v45 = vpop.f32.mrb[10].mxu0  ;;  %v3022_v54 = vpack.i.bf16 %v4736_v0, %v4735_v30  ;;  %3137 = vlog2.f32 %v1806_v63 }
 0x186   :  { %v1023_v35 = vadd.f32 %v2841_v45, %v2789_v36  ;;  %v1017_v19 = vpop.f32.mrb[11].mxu0  ;;  %v1715_v12 = vmul.f32 1.442695, %v1674_v26 }
 0x187   :  { %v1018_v39 = vadd.f32 %v1017_v19, %v696_v52  ;;  %3023 = vrot.lane.b32.xlu0 %v3022_v54, %s3384_s3  ;;  %v1635_v19 = vand.u32 2147483647, %v3883_v41 }
 0x188   :  { %v3945_v6 = vadd.f32 %v3863_v15, %v1023_v35  ;;  %v1773_v35 = vmul.f32 -0.5, %v3916_v2  ;;  %3139 = vpow2.f32 %v1715_v12  ;;  %v1791_v12 = vmul.f32 -0.5, %v3930_v56 }
 0x189   :  { %v3949_v23 = vadd.f32 %v3863_v15, %v1018_v39  ;;  %v3132_v39 = vpop.eup %3131  ;;  %3141 = vpow2.f32 %v1697_v34  ;;  %v1667_v40 = vsub.f32 0.0, %v1635_v19  ;;  %v1776_v34 = vand.u32 2147483647, %v3916_v2 }
 0x18a   :  { %v1644_v30 = vand.u32 2147483647, %v3945_v6  ;;  %v4743_v48 = vmax.f32 %v3945_v6, 0.0  ;;  %v3960_v58 = vpop.eup %3133 }
 0x18b   :  { %v4742_v36 = vmax.f32 %v3949_v23, 0.0  ;;  %vm3980_vm0 = vcmp.lt.f32.partialorder %v1776_v34, 0.0004427343 }
 0x18c   :  { %v2792_v52 = vpop.f32.mrb[12].mxu1  ;;  %v1676_v45 = vsub.f32 0.0, %v1644_v30  ;;  %v1774_v30 = vadd.f32 1.0, %v1773_v35 }
 0x18d   :  { %v706_v26 = vpop.f32.mrb[13].mxu1  ;;  %v2844_v54 = vpop.f32.mrb[12].mxu0  ;;  %v3027_v32 = vpack.i.bf16 %v4743_v48, %v4742_v36  ;;  %v1792_v36 = vadd.f32 1.0, %v1791_v12 }
 0x18e   :  { %v1033_v43 = vadd.f32 %v2844_v54, %v2792_v52  ;;  %v1027_v0 = vpop.f32.mrb[13].mxu0  ;;  %v1719_v37 = vmul.f32 1.442695, %v1676_v45  ;;  %v1772_v54 = vmul.f32 0.6931472, %v3132_v39  ;;  %v1775_v35 = vmul.f32 %v3916_v2, %v1774_v30 }
 0x18f   :  { %v1028_v42 = vadd.f32 %v1027_v0, %v706_v26  ;;  %3028 = vrot.lane.b32.xlu0 %v3027_v32, %s3384_s3  ;;  %v1824_v0 = vadd.f32 1.0, %v3960_v58  ;;  %v3136_v26 = vpop.eup %3135  ;;  %v1701_v32 = vmul.f32 1.442695, %v1667_v40  ;;  %v1809_v45 = vmul.f32 -0.5, %v3936_v20 }
 0x190   :  { %v3964_v63 = vadd.f32 %v3863_v15, %v1033_v43  ;;  %3143 = vpow2.f32 %v1719_v37  ;;  %v1794_v40 = vand.u32 2147483647, %v3930_v56  ;;  %v3138_v16 = vpop.eup %3137  ;;  %v1778_v30 = vsel %vm3980_vm0, %v1775_v35, %v1772_v54 }
 0x191   :  { %v3968_v28 = vadd.f32 %v3863_v15, %v1028_v42  ;;  %v1790_v37 = vmul.f32 0.6931472, %v3136_v26  ;;  %3145 = vlog2.f32 %v1824_v0  ;;  %v1812_v54 = vand.u32 2147483647, %v3936_v20 }
 0x192   :  { %v4749_v52 = vmax.f32 %v3964_v63, 0.0  ;;  %v3987_v12 = vpop.eup %3139  ;;  %3147 = vpow2.f32 %v1701_v32  ;;  %vm1795_vm5 = vcmp.lt.f32.partialorder %v1794_v40, 0.0004427343  ;;  %v1808_v26 = vmul.f32 0.6931472, %v3138_v16 }
 0x193   :  { %v4748_v19 = vmax.f32 %v3968_v28, 0.0  ;;  %v3992_v34 = vpop.eup %3141  ;;  %v1842_v35 = vadd.f32 1.0, %v3987_v12  ;;  %v4822_v40 = vmax.f32 %v3880_v22, 0.0  ;;  %vm4006_vm6 = vcmp.lt.f32.partialorder %v1812_v54, 0.0004427343 }
 0x194   :  { %v2795_v43 = vpop.f32.mrb[14].mxu1  ;;  %v1761_v32 = vadd.f32 1.0, %v3992_v34  ;;  %v4833_v24 = vmax.f32 %v3964_v63, 0.0 }
 0x195   :  { %v716_v42 = vpop.f32.mrb[15].mxu1  ;;  %v2847_v48 = vpop.f32.mrb[14].mxu0  ;;  %v3032_v39 = vpack.i.bf16 %v4749_v52, %v4748_v19  ;;  %v1793_v19 = vmul.f32 %v3930_v56, %v1792_v36  ;;  %v1810_v52 = vadd.f32 1.0, %v1809_v45  ;;  %v1646_v56 = vand.u32 2147483647, %v3964_v63 }
 0x196   :  { %v1043_v29 = vadd.f32 %v2847_v48, %v2795_v43  ;;  %v1037_v2 = vpop.f32.mrb[15].mxu0  ;;  %v1827_v48 = vmul.f32 -0.5, %v3960_v58  ;;  %v4821_v43 = vmax.f32 %v3866_v27, 0.0  ;;  %3149 = vlog2.f32 %v1842_v35 }
 0x197   :  { %v3989_v7 = vadd.f32 %v1037_v2, %v716_v42  ;;  %3033 = vrot.lane.b32.xlu0 %v3032_v39, %s3384_s3  ;;  %v1796_v0 = vsel %vm1795_vm5, %v1793_v19, %v1790_v37  ;;  %v1811_v45 = vmul.f32 %v3936_v20, %v1810_v52  ;;  %3151 = vlog2.f32 %v1761_v32 }
 0x198   :  { %v2050_v33 = vadd.f32 %v1778_v30, %v4821_v43  ;;  %v1828_v42 = vadd.f32 1.0, %v1827_v48  ;;  %v2052_v30 = vadd.f32 %v1796_v0, %v4822_v40  ;;  %v1678_v48 = vsub.f32 0.0, %v1646_v56 }
 0x199   :  { %v1814_v43 = vsel %vm4006_vm6, %v1811_v45, %v1808_v26  ;;  %v4825_v35 = vmax.f32 %v3894_v10, 0.0  ;;  %v4034_v16 = vadd.f32 %v3863_v15, %v1043_v29 }
 0x19a   :  { %v4013_v25 = vpop.eup %3143  ;;  %v1829_v0 = vmul.f32 %v3960_v58, %v1828_v42 }
 0x19b   :  { %2115 = vrot.lane.b32.xlu0 %v2050_v33, %s3385_s22  ;;  %v1830_v33 = vand.u32 2147483647, %v3960_v58  ;;  %v3146_v52 = vpop.eup %3145  ;;  %v2054_v45 = vadd.f32 %v1814_v43, %v4825_v35  ;;  %v1860_v56 = vadd.f32 1.0, %v4013_v25  ;;  %v1637_v58 = vand.u32 2147483647, %v3897_v60 }
 0x19c   :  { %v2798_v36 = vpop.f32.mrb[16].mxu1  ;;  %v4027_v40 = vpop.eup %3147 }
 0x19d   :  { %v726_v39 = vpop.f32.mrb[17].mxu1  ;;  %v2850_v2 = vpop.f32.mrb[16].mxu0  ;;  %vm1831_vm7 = vcmp.lt.f32.partialorder %v1830_v33, 0.0004427343  ;;  %v4826_v33 = vmax.f32 %v3908_v3, 0.0  ;;  %v1779_v59 = vadd.f32 1.0, %v4027_v40  ;;  %3153 = vlog2.f32 %v1860_v56 }
 0x19e   :  { %v1053_v19 = vadd.f32 %v2850_v2, %v2798_v36  ;;  %v1047_v37 = vpop.f32.mrb[17].mxu0  ;;  %v1764_v36 = vmul.f32 -0.5, %v3992_v34  ;;  %v1826_v2 = vmul.f32 0.6931472, %v3146_v52 }
 0x19f   :  { %v1048_v20 = vadd.f32 %v1047_v37, %v726_v39  ;;  %2119 = vrot.lane.b32.xlu0 %v2052_v30, %s3385_s22  ;;  %v1845_v39 = vmul.f32 -0.5, %v3987_v12  ;;  %v1723_v30 = vmul.f32 1.442695, %v1678_v48  ;;  %3155 = vlog2.f32 %v1779_v59 }
 0x1a0   :  { %v4017_v54 = vadd.f32 %v3863_v15, %v1053_v19  ;;  %v1832_v42 = vsel %vm1831_vm7, %v1829_v0, %v1826_v2  ;;  %v1765_v43 = vadd.f32 1.0, %v1764_v36  ;;  %v1848_v0 = vand.u32 2147483647, %v3987_v12 }
 0x1a1   :  { %v4022_v26 = vadd.f32 %v3863_v15, %v1048_v20  ;;  %v2056_v35 = vadd.f32 %v1832_v42, %v4826_v33  ;;  %v1846_v32 = vadd.f32 1.0, %v1845_v39  ;;  %v1767_v2 = vand.u32 2147483647, %v3992_v34  ;;  %v3150_v39 = vpop.eup %3149 }
 0x1a2   :  { %v4827_v48 = vmax.f32 %v4017_v54, 0.0  ;;  %3157 = vpow2.f32 %v1723_v30  ;;  %v1648_v42 = vand.u32 2147483647, %v4034_v16  ;;  %v1844_v56 = vmul.f32 0.6931472, %v3150_v39 }
 0x1a3   :  { %2123 = vrot.lane.b32.xlu0 %v2054_v45, %s3385_s22  ;;  %v4754_v37 = vmax.f32 %v4022_v26, 0.0  ;;  %v1669_v45 = vsub.f32 0.0, %v1637_v58  ;;  %v1863_v58 = vmul.f32 -0.5, %v4013_v25  ;;  %vm1849_vm8 = vcmp.lt.f32.partialorder %v1848_v0, 0.0004427343 }
 0x1a4   :  { %v2801_v19 = vpop.f32.mrb[18].mxu1  ;;  %v1782_v30 = vmul.f32 -0.5, %v4027_v40  ;;  %vm1768_vm9 = vcmp.lt.f32.partialorder %v1767_v2, 0.0004427343 }
 0x1a5   :  { %v736_v20 = vpop.f32.mrb[19].mxu1  ;;  %v2853_v52 = vpop.f32.mrb[18].mxu0  ;;  %v3037_v29 = vpack.i.bf16 %v4827_v48, %v4754_v37  ;;  %v1864_v0 = vadd.f32 1.0, %v1863_v58 }
 0x1a6   :  { %v1063_v21 = vadd.f32 %v2853_v52, %v2801_v19  ;;  %v1057_v46 = vpop.f32.mrb[19].mxu0  ;;  %v1766_v19 = vmul.f32 %v3992_v34, %v1765_v43  ;;  %v3152_v52 = vpop.eup %3151  ;;  %v1680_v34 = vsub.f32 0.0, %v1648_v42  ;;  %v4828_v43 = vmax.f32 %v3924_v14, 0.0 }
 0x1a7   :  { %v1058_v36 = vadd.f32 %v1057_v46, %v736_v20  ;;  %2127 = vrot.lane.b32.xlu0 %v2056_v35, %s3385_s22  ;;  %3038 = vrot.lane.b32.xlu1 %v3037_v29, %s3384_s3  ;;  %v1847_v46 = vmul.f32 %v3987_v12, %v1846_v32  ;;  %v1763_v59 = vmul.f32 0.6931472, %v3152_v52  ;;  %v1705_v35 = vmul.f32 1.442695, %v1669_v45 }
 0x1a8   :  { %v4056_v20 = vadd.f32 %v3863_v15, %v1063_v21  ;;  %v1639_v12 = vand.u32 2147483647, %v3911_v51  ;;  %v4829_v32 = vmax.f32 %v3869_v44, 0.0  ;;  %v1866_v42 = vand.u32 2147483647, %v4013_v25 }
 0x1a9   :  { %v4051_v33 = vadd.f32 %v3863_v15, %v1058_v36  ;;  %v1850_v48 = vsel %vm1849_vm8, %v1847_v46, %v1844_v56  ;;  %v1769_v36 = vsel %vm1768_vm9, %v1766_v19, %v1763_v59  ;;  %v1783_v19 = vadd.f32 1.0, %v1782_v30 }
 0x1aa   :  { %v2058_v29 = vadd.f32 %v1850_v48, %v4828_v43  ;;  %v2049_v37 = vadd.f32 %v1769_v36, %v4829_v32  ;;  %v4757_v56 = vmax.f32 %v4056_v20, 0.0  ;;  %3159 = vpow2.f32 %v1705_v35  ;;  %v3154_v48 = vpop.eup %3153 }
 0x1ab   :  { %v4756_v52 = vmax.f32 %v4051_v33, 0.0  ;;  %v1785_v59 = vand.u32 2147483647, %v4027_v40  ;;  %v1727_v43 = vmul.f32 1.442695, %v1680_v34  ;;  %v1671_v35 = vsub.f32 0.0, %v1639_v12 }
 0x1ac   :  { %v2804_v39 = vpop.f32.mrb[20].mxu1  ;;  %2131 = vrot.lane.b32.xlu0 %v2058_v29, %s3385_s22  ;;  %2113 = vrot.lane.b32.xlu1 %v2049_v37, %s3385_s22  ;;  %v1650_v29 = vand.u32 2147483647, %v4017_v54  ;;  %v1862_v36 = vmul.f32 0.6931472, %v3154_v48  ;;  %v1784_v32 = vmul.f32 %v4027_v40, %v1783_v19  ;;  %v4830_v34 = vmax.f32 %v3945_v6, 0.0 }
 0x1ad   :  { %v746_v21 = vpop.f32.mrb[21].mxu1  ;;  %v2856_v17 = vpop.f32.mrb[20].mxu0  ;;  %v3042_v58 = vpack.i.bf16 %v4757_v56, %v4756_v52  ;;  %vm1867_vm10 = vcmp.lt.f32.partialorder %v1866_v42, 0.0004427343  ;;  %vm1786_vm11 = vcmp.lt.f32.partialorder %v1785_v59, 0.0004427343  ;;  %3161 = vpow2.f32 %v1727_v43 }
 0x1ae   :  { %v1073_v45 = vadd.f32 %v2856_v17, %v2804_v39  ;;  %v1067_v2 = vpop.f32.mrb[21].mxu0  ;;  %v3156_v17 = vpop.eup %3155  ;;  %v1865_v39 = vmul.f32 %v4013_v25, %v1864_v0  ;;  %v1682_v38 = vsub.f32 0.0, %v1650_v29  ;;  %v4831_v25 = vmax.f32 %v3883_v41, 0.0 }
 0x1af   :  { %v1068_v46 = vadd.f32 %v1067_v2, %v746_v21  ;;  %v3158_v30 = vpop.eup %3157  ;;  %v1781_v37 = vmul.f32 0.6931472, %v3156_v17  ;;  %v1709_v19 = vmul.f32 1.442695, %v1671_v35 }
 0x1b0   :  { %v1868_v21 = vsel %vm1867_vm10, %v1865_v39, %v1862_v36  ;;  %3043 = vrot.lane.b32.xlu1 %v3042_v58, %s3384_s3  ;;  %v1878_v42 = vadd.f32 1.0, %v3158_v30  ;;  %v1641_v58 = vand.u32 2147483647, %v3928_v8  ;;  %v4088_v17 = vadd.f32 %v3863_v15, %v1073_v45 }
 0x1b1   :  { %v2060_v2 = vadd.f32 %v1868_v21, %v4830_v34  ;;  %v1787_v52 = vsel %vm1786_vm11, %v1784_v32, %v1781_v37  ;;  %v4081_v48 = vadd.f32 %v3863_v15, %v1068_v46  ;;  %v1881_v39 = vmul.f32 -0.5, %v3158_v30 }
 0x1b2   :  { %v2051_v12 = vadd.f32 %v1787_v52, %v4831_v25  ;;  %4832 = vst [vmem:[#allocation34_spill] sm:$0xff] %v4088_v17  ;;  %3163 = vlog2.f32 %v1878_v42  ;;  %v1731_v52 = vmul.f32 1.442695, %v1682_v38  ;;  %v1673_v35 = vsub.f32 0.0, %v1641_v58 }
 0x1b3   :  { %2135 = vrot.lane.b32.xlu0 %v2060_v2, %s3385_s22  ;;  %v4759_v36 = vmax.f32 %v4081_v48, 0.0  ;;  %3165 = vpow2.f32 %v1709_v19  ;;  %v4760_v37 = vmax.f32 %v4088_v17, 0.0  ;;  %v2597_v25 = vmul.f32 -1.442695, %v3866_v27 }
 0x1b4   :  { %v2807_v56 = vpop.f32.mrb[22].mxu1  ;;  %2117 = vrot.lane.b32.xlu1 %v2051_v12, %s3385_s22  ;;  %v4091_v29 = vpop.eup %3159  ;;  %3167 = vpow2.f32 %v1731_v52  ;;  %v1882_v12 = vadd.f32 1.0, %v1881_v39  ;;  %v1643_v58 = vand.u32 2147483647, %v3949_v23  ;;  %v1653_v53 = vand.u32 2147483647, %v4081_v48 }
 0x1b5   :  { %v2859_v0 = vpop.f32.mrb[22].mxu0  ;;  %v756_v40 = vpop.f32.mrb[23].mxu1  ;;  %v1797_v32 = vadd.f32 1.0, %v4091_v29  ;;  %v3047_v21 = vpack.i.bf16 %v4760_v37, %v4759_v36  ;;  %v1800_v36 = vmul.f32 -0.5, %v4091_v29  ;;  %v1803_v44 = vand.u32 2147483647, %v4091_v29 }
 0x1b6   :  { %v1083_v59 = vadd.f32 %v2859_v0, %v2807_v56  ;;  %v1077_v43 = vpop.f32.mrb[23].mxu0  ;;  %v1652_v56 = vand.u32 2147483647, %v4056_v20  ;;  %v1883_v39 = vmul.f32 %v3158_v30, %v1882_v12 }
 0x1b7   :  { %v1078_v46 = vadd.f32 %v1077_v43, %v756_v40  ;;  %v4101_v2 = vpop.eup %3161  ;;  %3169 = vlog2.f32 %v1797_v32  ;;  %v1713_v40 = vmul.f32 1.442695, %v1673_v35  ;;  %v1884_v43 = vand.u32 2147483647, %v3158_v30 }
 0x1b8   :  { %v1684_v19 = vsub.f32 0.0, %v1652_v56  ;;  %3048 = vrot.lane.b32.xlu1 %v3047_v21, %s3384_s3  ;;  %v1896_v37 = vadd.f32 1.0, %v4101_v2  ;;  %3171 = vpow2.f32 %v2597_v25  ;;  %v1675_v56 = vsub.f32 0.0, %v1643_v58 }
 0x1b9   :  { %3173 = vpow2.f32 %v1713_v40  ;;  %vm1885_vm12 = vcmp.lt.f32.partialorder %v1884_v43, 0.0004427343  ;;  %v1654_v21 = vand.u32 2147483647, %v4088_v17  ;;  %v1801_v5 = vadd.f32 1.0, %v1800_v36 }
 0x1ba   :  { %v1735_v32 = vmul.f32 1.442695, %v1684_v19  ;;  %3175 = vlog2.f32 %v1896_v37  ;;  %v4126_v43 = vadd.f32 %v3863_v15, %v3989_v7  ;;  %vm1804_vm13 = vcmp.lt.f32.partialorder %v1803_v44, 0.0004427343 }
 0x1bb   :  { %3177 = vpow2.f32 %v2596_v13  ;;  %v1717_v13 = vmul.f32 1.442695, %v1675_v56  ;;  %v1686_v58 = vsub.f32 0.0, %v1654_v21 }
 0x1bc   :  { %v2810_v45 = vpop.f32.mrb[24].mxu1  ;;  %v3164_v52 = vpop.eup %3163  ;;  %3179 = vpow2.f32 %v1735_v32  ;;  %v1647_v56 = vand.u32 2147483647, %v4126_v43  ;;  %v1902_v32 = vand.u32 2147483647, %v4101_v2 }
 0x1bd   :  { %v2862_v34 = vpop.f32.mrb[24].mxu0  ;;  %v766_v38 = vpop.f32.mrb[25].mxu1  ;;  %v1880_v27 = vmul.f32 0.6931472, %v3164_v52 }
 0x1be   :  { %v1093_v0 = vadd.f32 %v2862_v34, %v2810_v45  ;;  %v1087_v42 = vpop.f32.mrb[25].mxu0  ;;  %v1645_v45 = vand.u32 2147483647, %v3968_v28  ;;  %v4111_v9 = vpop.eup %3165  ;;  %v1679_v61 = vsub.f32 0.0, %v1647_v56  ;;  %vm1903_vm14 = vcmp.lt.f32.partialorder %v1902_v32, 0.0004427343 }
 0x1bf   :  { %v1088_v35 = vadd.f32 %v1087_v42, %v766_v38  ;;  %v1886_v34 = vsel %vm1885_vm12, %v1883_v39, %v1880_v27  ;;  %v4117_v38 = vadd.f32 %v3863_v15, %v1083_v59  ;;  %v4120_v42 = vadd.f32 %v3863_v15, %v1078_v46  ;;  %v4122_v19 = vpop.eup %3167 }
 0x1c0   :  { %v2062_v25 = vadd.f32 %v1886_v34, %v4833_v24  ;;  %v1677_v37 = vsub.f32 0.0, %v1645_v45  ;;  %v1899_v59 = vmul.f32 -0.5, %v4101_v2  ;;  %v1815_v46 = vadd.f32 1.0, %v4111_v9 }
 0x1c1   :  { %v3170_v36 = vpop.eup %3169  ;;  %v1802_v27 = vmul.f32 %v4091_v29, %v1801_v5  ;;  %v4135_v7 = vadd.f32 %v3863_v15, %v1093_v0  ;;  %v4138_v39 = vadd.f32 %v3863_v15, %v1088_v35  ;;  %v1649_v45 = vand.u32 2147483647, %v4022_v26 }
 0x1c2   :  { %2139 = vrot.lane.b32.xlu0 %v2062_v25, %s3385_s22  ;;  %v1799_v52 = vmul.f32 0.6931472, %v3170_v36  ;;  %v1914_v21 = vadd.f32 1.0, %v4122_v19  ;;  %v4145_v25 = vpop.eup %3171  ;;  %v1651_v5 = vand.u32 2147483647, %v4051_v33  ;;  %v4834_v29 = vmax.f32 %v3897_v60, 0.0 }
 0x1c3   :  { %v1900_v35 = vadd.f32 1.0, %v1899_v59  ;;  %3181 = vlog2.f32 %v1815_v46  ;;  %v1739_v36 = vmul.f32 1.442695, %v1686_v58  ;;  %v4835_v18 = vmax.f32 %v4120_v42, 0.0 }
 0x1c4   :  { %v2813_v31 = vpop.f32.mrb[26].mxu1  ;;  %v1805_v34 = vsel %vm1804_vm13, %v1802_v27, %v1799_v52  ;;  %3183 = vpow2.f32 %v1717_v13  ;;  %v4836_v1 = vmax.f32 %v4117_v38, 0.0  ;;  %v1818_v59 = vmul.f32 -0.5, %v4111_v9 }
 0x1c5   :  { %v2865_v30 = vpop.f32.mrb[26].mxu0  ;;  %v776_v12 = vpop.f32.mrb[27].mxu1  ;;  %v2053_v0 = vadd.f32 %v1805_v34, %v4834_v29  ;;  %v4773_v46 = vmax.f32 %v4138_v39, 0.0  ;;  %v4774_v34 = vmax.f32 %v4135_v7, 0.0  ;;  %v1721_v29 = vmul.f32 1.442695, %v1677_v37 }
 0x1c6   :  { %v1097_v40 = vpop.f32.mrb[27].mxu0  ;;  %v4129_v24 = vadd.f32 %v2865_v30, %v2813_v31  ;;  %v4150_v30 = vpop.eup %3173  ;;  %v3052_v11 = vpack.i.bf16 %v4836_v1, %v4835_v18  ;;  %3185 = vlog2.f32 %v1914_v21  ;;  %v1901_v57 = vmul.f32 %v4101_v2, %v1900_v35 }
 0x1c7   :  { %v1098_v31 = vadd.f32 %v1097_v40, %v776_v12  ;;  %2121 = vrot.lane.b32.xlu1 %v2053_v0, %s3385_s22  ;;  %v3176_v58 = vpop.eup %3175  ;;  %v1681_v12 = vsub.f32 0.0, %v1649_v45  ;;  %v1656_v0 = vand.u32 2147483647, %v4117_v38  ;;  %v4169_v1 = vpack.i.bf16 %v4774_v34, %v4773_v46 }
 0x1c8   :  { %v4161_v40 = vpop.eup %3177  ;;  %v1898_v4 = vmul.f32 0.6931472, %v3176_v58  ;;  %v1683_v62 = vsub.f32 0.0, %v1651_v5  ;;  %v4775_v37 = vmax.f32 %v4034_v16, 0.0  ;;  %v1833_v56 = vadd.f32 1.0, %v4150_v30 }
 0x1c9   :  { %v4171_v18 = vpop.eup %3179  ;;  %3187 = vpow2.f32 %v1739_v36  ;;  %v1819_v21 = vadd.f32 1.0, %v1818_v59  ;;  %v1917_v2 = vmul.f32 -0.5, %v4122_v19  ;;  %v1725_v35 = vmul.f32 1.442695, %v1679_v61 }
 0x1ca   :  { %v1904_v45 = vsel %vm1903_vm14, %v1901_v57, %v1898_v4  ;;  %v4177_v58 = vmul.f32 1.442695, %v1681_v12  ;;  %3189 = vlog2.f32 %v1833_v56  ;;  %v1688_v5 = vsub.f32 0.0, %v1656_v0 }
 0x1cb   :  { %3053 = vrot.lane.b32.xlu1 %v3052_v11, %s3384_s3  ;;  %v2064_v46 = vadd.f32 %v1904_v45, %v4775_v37  ;;  %v1821_v34 = vand.u32 2147483647, %v4111_v9  ;;  %v1932_v36 = vadd.f32 1.0, %v4171_v18  ;;  %3191 = vpow2.f32 %v1721_v29 }
 0x1cc   :  { %v2816_v44 = vpop.f32.mrb[28].mxu1  ;;  %v4185_v4 = vmul.f32 1.442695, %v1683_v62  ;;  %v1658_v11 = vand.u32 2147483647, %v4135_v7  ;;  %v4190_v61 = vadd.f32 %v3863_v15, %v1098_v31  ;;  %v1820_v0 = vmul.f32 %v4111_v9, %v1819_v21 }
 0x1cd   :  { %v2868_v52 = vpop.f32.mrb[28].mxu0  ;;  %v786_v27 = vpop.f32.mrb[29].mxu1  ;;  %2143 = vrot.lane.b32.xlu0 %v2064_v46, %s3385_s22  ;;  %v1918_v56 = vadd.f32 1.0, %v1917_v2  ;;  %3193 = vlog2.f32 %v1932_v36  ;;  %v4198_v37 = vadd.f32 %v3863_v15, %v4129_v24  ;;  %v1920_v31 = vand.u32 2147483647, %v4122_v19 }
 0x1ce   :  { %v1107_v13 = vpop.f32.mrb[29].mxu0  ;;  %v4182_v32 = vadd.f32 %v2868_v52, %v2816_v44  ;;  %v3182_v12 = vpop.eup %3181  ;;  %v1836_v44 = vmul.f32 -0.5, %v4150_v30  ;;  %3195 = vpow2.f32 %v1725_v35  ;;  %v1743_v9 = vmul.f32 1.442695, %v1688_v5 }
 0x1cf   :  { %v4194_v29 = vpop.eup %3183  ;;  %v1817_v62 = vmul.f32 0.6931472, %v3182_v12  ;;  %v1108_v46 = vadd.f32 %v1107_v13, %v786_v27  ;;  %vm1822_vm15 = vcmp.lt.f32.partialorder %v1821_v34, 0.0004427343  ;;  %v1655_v2 = vand.u32 2147483647, %v4120_v42 }
 0x1d0   :  { %v3186_v21 = vpop.eup %3185  ;;  %v1935_v55 = vmul.f32 -0.5, %v4171_v18  ;;  %v1919_v50 = vmul.f32 %v4122_v19, %v1918_v56  ;;  %v1837_v27 = vadd.f32 1.0, %v1836_v44  ;;  %v1690_v13 = vsub.f32 0.0, %v1658_v11 }
 0x1d1   :  { %v1823_v36 = vsel %vm1822_vm15, %v1820_v0, %v1817_v62  ;;  %v1916_v47 = vmul.f32 0.6931472, %v3186_v21  ;;  %vm1921_vm1 = vcmp.lt.f32.partialorder %v1920_v31, 0.0004427343  ;;  %v1839_v35 = vand.u32 2147483647, %v4150_v30 }
 0x1d2   :  { %v2055_v24 = vadd.f32 %v1823_v36, %v4837_v49  ;;  %v4785_v34 = vmax.f32 %v4198_v37, 0.0  ;;  %v1685_v0 = vsub.f32 0.0, %v1653_v53  ;;  %3197 = vpow2.f32 %v1743_v9 }
 0x1d3   :  { %v4210_v5 = vpop.eup %3187  ;;  %v1922_v62 = vsel %vm1921_vm1, %v1919_v50, %v1916_v47  ;;  %v1851_v12 = vadd.f32 1.0, %v4194_v29  ;;  %v1660_v21 = vand.u32 2147483647, %v4198_v37  ;;  %v4838_v19 = vmax.f32 %v4017_v54, 0.0 }
 0x1d4   :  { %v2819_v57 = vpop.f32.mrb[30].mxu1  ;;  %2125 = vrot.lane.b32.xlu1 %v2055_v24, %s3385_s22  ;;  %v3190_v49 = vpop.eup %3189  ;;  %v1936_v56 = vadd.f32 1.0, %v1935_v55  ;;  %v4839_v44 = vmax.f32 %v4190_v61, 0.0  ;;  %v1687_v36 = vsub.f32 0.0, %v1655_v2  ;;  %v1838_v9 = vmul.f32 %v4150_v30, %v1837_v27 }
 0x1d5   :  { %v2871_v59 = vpop.f32.mrb[30].mxu0  ;;  %v796_v52 = vpop.f32.mrb[31].mxu1  ;;  %v2066_v11 = vadd.f32 %v1922_v62, %v4838_v19  ;;  %v1835_v53 = vmul.f32 0.6931472, %v3190_v49  ;;  %v1938_v50 = vand.u32 2147483647, %v4171_v18  ;;  %v4227_v62 = vadd.f32 %v3863_v15, %v1108_v46 }
 0x1d6   :  { %v1117_v45 = vpop.f32.mrb[31].mxu0  ;;  %v3062_v31 = vpack.i.bf16 %v4785_v34, %v4839_v44  ;;  %v4223_v47 = vpop.eup %3191  ;;  %v1747_v24 = vmul.f32 1.442695, %v1690_v13  ;;  %vm1840_vm2 = vcmp.lt.f32.partialorder %v1839_v35, 0.0004427343  ;;  %v1123_v55 = vadd.f32 %v2871_v59, %v2819_v57 }
 0x1d7   :  { %2147 = vrot.lane.b32.xlu0 %v2066_v11, %s3385_s22  ;;  %v3194_v19 = vpop.eup %3193  ;;  %v1841_v2 = vsel %vm1840_vm2, %v1838_v9, %v1835_v53  ;;  %v4233_v30 = vadd.f32 %v3863_v15, %v4182_v32  ;;  %3199 = vlog2.f32 %v1851_v12  ;;  %v1950_v27 = vadd.f32 1.0, %v4210_v5 }
 0x1d8   :  { %3058 = vrot.lane.b32.xlu1 %v4169_v1, %s3384_s3  ;;  %v1657_v13 = vand.u32 2147483647, %v4138_v39  ;;  %v1692_v49 = vsub.f32 0.0, %v1660_v21  ;;  %v1934_v35 = vmul.f32 0.6931472, %v3194_v19  ;;  %v1937_v46 = vmul.f32 %v4171_v18, %v1936_v56  ;;  %v4238_v11 = vpop.eup %3195 }
 0x1d9   :  { %v1659_v57 = vand.u32 2147483647, %v4190_v61  ;;  %v4840_v1 = vmax.f32 %v3928_v8, 0.0  ;;  %vm1939_vm3 = vcmp.lt.f32.partialorder %v1938_v50, 0.0004427343  ;;  %3201 = vlog2.f32 %v1950_v27 }
 0x1da   :  { %v1940_v32 = vsel %vm1939_vm3, %v1937_v46, %v1934_v35  ;;  %v1854_v12 = vmul.f32 -0.5, %v4194_v29  ;;  %v1118_v44 = vadd.f32 %v1117_v45, %v796_v52  ;;  %v4781_v53 = vmax.f32 %v4227_v62, 0.0 }
 0x1db   :  { %v2057_v59 = vadd.f32 %v1841_v2, %v4840_v1  ;;  %3203 = vpow2.f32 %v4177_v58  ;;  %v1737_v21 = vmul.f32 1.442695, %v1685_v0  ;;  %v1662_v18 = vand.u32 2147483647, %v4233_v30 }
 0x1dc   :  { %v4841_v56 = vmax.f32 %v4056_v20, 0.0  ;;  %3205 = vpow2.f32 %v1747_v24  ;;  %v1689_v19 = vsub.f32 0.0, %v1657_v13  ;;  %v1953_v50 = vmul.f32 -0.5, %v4210_v5  ;;  %v4252_v27 = vpop.eup %3197 }
 0x1dd   :  { %2129 = vrot.lane.b32.xlu1 %v2057_v59, %s3385_s22  ;;  %v4784_v2 = vmax.f32 %v4233_v30, 0.0  ;;  %3207 = vpow2.f32 %v4185_v4  ;;  %v1741_v52 = vmul.f32 1.442695, %v1687_v36  ;;  %v1691_v58 = vsub.f32 0.0, %v1659_v57 }
 0x1de   :  { %v2068_v9 = vadd.f32 %v1940_v32, %v4841_v56  ;;  %v4257_v45 = vadd.f32 %v3863_v15, %v1123_v55  ;;  %v1751_v0 = vmul.f32 1.442695, %v1692_v49  ;;  %v1661_v35 = vand.u32 2147483647, %v4227_v62 }
 0x1df   :  { %v1855_v24 = vadd.f32 1.0, %v1854_v12  ;;  %v3067_v13 = vpack.i.bf16 %v4784_v2, %v4781_v53  ;;  %v1694_v46 = vsub.f32 0.0, %v1662_v18  ;;  %v1857_v4 = vand.u32 2147483647, %v4194_v29 }
 0x1e0   :  { %2151 = vrot.lane.b32.xlu0 %v2068_v9, %s3385_s22  ;;  %v1956_v36 = vand.u32 2147483647, %v4210_v5  ;;  %v1869_v57 = vadd.f32 1.0, %v4223_v47  ;;  %3209 = vpow2.f32 %v1737_v21  ;;  %v1745_v55 = vmul.f32 1.442695, %v1689_v19 }
 0x1e1   :  { %3063 = vrot.lane.b32.xlu1 %v3062_v31, %s3384_s3  ;;  %v1954_v49 = vadd.f32 1.0, %v1953_v50  ;;  %v4269_v1 = vadd.f32 %v3863_v15, %v1118_v44  ;;  %v3200_v59 = vpop.eup %3199  ;;  %3211 = vpow2.f32 %v1741_v52  ;;  %v1749_v32 = vmul.f32 1.442695, %v1691_v58 }
 0x1e2   :  { %v1664_v12 = vand.u32 2147483647, %v4257_v45  ;;  %v1968_v18 = vadd.f32 1.0, %v4252_v27  ;;  %v1693_v31 = vsub.f32 0.0, %v1661_v35  ;;  %v1853_v56 = vmul.f32 0.6931472, %v3200_v59 }
 0x1e3   :  { %v1856_v9 = vmul.f32 %v4194_v29, %v1855_v24  ;;  %3213 = vlog2.f32 %v1869_v57  ;;  %v3202_v53 = vpop.eup %3201  ;;  %v1755_v21 = vmul.f32 1.442695, %v1694_v46  ;;  %vm1858_vm4 = vcmp.lt.f32.partialorder %v1857_v4, 0.0004427343 }
 0x1e4   :  { %3215 = vpow2.f32 %v1751_v0  ;;  %vm4274_vm0 = vcmp.lt.f32.partialorder %v1956_v36, 0.0004427343  ;;  %v1952_v44 = vmul.f32 0.6931472, %v3202_v53  ;;  %v1955_v50 = vmul.f32 %v4210_v5, %v1954_v49 }
 0x1e5   :  { %v1859_v15 = vsel %vm1858_vm4, %v1856_v9, %v1853_v56  ;;  %v4782_v52 = vmax.f32 %v4269_v1, 0.0  ;;  %v4280_v58 = vpop.eup %3203  ;;  %v4844_v35 = vmax.f32 %v3949_v23, 0.0  ;;  %v1696_v24 = vsub.f32 0.0, %v1664_v12 }
 0x1e6   :  { %v1872_v0 = vmul.f32 -0.5, %v4223_v47  ;;  %3217 = vlog2.f32 %v1968_v18  ;;  %v4285_v46 = vpop.eup %3205  ;;  %v1753_v4 = vmul.f32 1.442695, %v1693_v31  ;;  %v1958_v53 = vsel %vm4274_vm0, %v1955_v50, %v1952_v44 }
 0x1e7   :  { %v2059_v29 = vadd.f32 %v1859_v15, %v4844_v35  ;;  %3219 = vpow2.f32 %v1745_v55  ;;  %v4783_v5 = vmax.f32 %v4257_v45, 0.0  ;;  %v4290_v36 = vpop.eup %3207  ;;  %v4845_v57 = vmax.f32 %v4088_v17, 0.0 }
 0x1e8   :  { %3221 = vpow2.f32 %v1749_v32  ;;  %v1971_v59 = vmul.f32 -0.5, %v4252_v27  ;;  %v1887_v12 = vadd.f32 1.0, %v4238_v11  ;;  %v1663_v55 = vand.u32 2147483647, %v4269_v1 }
 0x1e9   :  { %2133 = vrot.lane.b32.xlu1 %v2059_v29, %s3385_s22  ;;  %v2070_v49 = vadd.f32 %v1958_v53, %v4845_v57  ;;  %3223 = vpow2.f32 %v1755_v21  ;;  %v4302_v18 = vpack.i.bf16 %v4783_v5, %v4782_v52  ;;  %v1759_v31 = vmul.f32 1.442695, %v1696_v24 }
 0x1ea   :  { %v1873_v32 = vadd.f32 1.0, %v1872_v0  ;;  %3225 = vlog2.f32 %v1887_v12  ;;  %v1986_v56 = vadd.f32 1.0, %v4285_v46  ;;  %v4306_v9 = vpop.eup %3209  ;;  %v1875_v21 = vand.u32 2147483647, %v4223_v47 }
 0x1eb   :  { %2155 = vrot.lane.b32.xlu0 %v2070_v49, %s3385_s22  ;;  %3227 = vpow2.f32 %v1753_v4  ;;  %v1974_v19 = vand.u32 2147483647, %v4252_v27  ;;  %v1905_v15 = vadd.f32 1.0, %v4280_v58  ;;  %v4311_v44 = vpop.eup %3211  ;;  %v1972_v50 = vadd.f32 1.0, %v1971_v59 }
 0x1ec   :  { %3229 = vlog2.f32 %v1986_v56  ;;  %v4315_v29 = vmul.f32 -1.442695, %v3880_v22  ;;  %v1890_v24 = vmul.f32 -0.5, %v4238_v11  ;;  %v1695_v4 = vsub.f32 0.0, %v1663_v55 }
 0x1ed   :  { %3068 = vrot.lane.b32.xlu1 %v3067_v13, %s3384_s3  ;;  %v3214_v35 = vpop.eup %3213  ;;  %3231 = vlog2.f32 %v1905_v15  ;;  %v1874_v57 = vmul.f32 %v4223_v47, %v1873_v32  ;;  %v1989_v49 = vmul.f32 -0.5, %v4285_v46  ;;  %vm1876_vm5 = vcmp.lt.f32.partialorder %v1875_v21, 0.0004427343 }
 0x1ee   :  { %v4318_v0 = vpop.eup %3215  ;;  %v1871_v53 = vmul.f32 0.6931472, %v3214_v35  ;;  %3233 = vpow2.f32 %v1759_v31  ;;  %vm4322_vm6 = vcmp.lt.f32.partialorder %v1974_v19, 0.0004427343  ;;  %v1923_v22 = vadd.f32 1.0, %v4290_v36 }
 0x1ef   :  { %v1973_v56 = vmul.f32 %v4252_v27, %v1972_v50  ;;  %v1893_v15 = vand.u32 2147483647, %v4238_v11  ;;  %v1908_v55 = vmul.f32 -0.5, %v4280_v58  ;;  %v4848_v47 = vmax.f32 %v3968_v28, 0.0 }
 0x1f0   :  { %v3218_v59 = vpop.eup %3217  ;;  %v1877_v12 = vsel %vm1876_vm5, %v1874_v57, %v1871_v53  ;;  %v1891_v21 = vadd.f32 1.0, %v1890_v24  ;;  %v1992_v19 = vand.u32 2147483647, %v4285_v46  ;;  %v1990_v5 = vadd.f32 1.0, %v1989_v49 }
 0x1f1   :  { %v4330_v35 = vpop.eup %3219  ;;  %v2061_v31 = vadd.f32 %v1877_v12, %v4848_v47  ;;  %v1970_v32 = vmul.f32 0.6931472, %v3218_v59  ;;  %v1911_v53 = vand.u32 2147483647, %v4280_v58  ;;  %3235 = vlog2.f32 %v1923_v22 }
 0x1f2   :  { %v4335_v52 = vpop.eup %3221  ;;  %v2004_v27 = vadd.f32 1.0, %v4318_v0  ;;  %v1757_v57 = vmul.f32 1.442695, %v1695_v4  ;;  %v1179_v24 = vmax.f32 %v4126_v43, 0.0  ;;  %v1941_v59 = vadd.f32 1.0, %v4306_v9 }
 0x1f3   :  { %v4339_v50 = vpop.eup %3223  ;;  %2137 = vrot.lane.b32.xlu1 %v2061_v31, %s3385_s22  ;;  %v1976_v12 = vsel %vm4322_vm6, %v1973_v56, %v1970_v32  ;;  %v4849_v49 = vmax.f32 %v4117_v38, 0.0  ;;  %v1909_v34 = vadd.f32 1.0, %v1908_v55  ;;  %v1926_v22 = vmul.f32 -0.5, %v4290_v36 }
 0x1f4   :  { %v3226_v47 = vpop.eup %3225  ;;  %3237 = vlog2.f32 %v2004_v27  ;;  %v1892_v31 = vmul.f32 %v4238_v11, %v1891_v21  ;;  %vm4352_vm7 = vcmp.lt.f32.partialorder %v1893_v15, 0.0004427343  ;;  %v1991_v32 = vmul.f32 %v4285_v46, %v1990_v5 }
 0x1f5   :  { %v2072_v2 = vadd.f32 %v1976_v12, %v4849_v49  ;;  %v4349_v17 = vpop.eup %3227  ;;  %v1889_v4 = vmul.f32 0.6931472, %v3226_v47  ;;  %3239 = vlog2.f32 %v1941_v59  ;;  %vm4358_vm8 = vcmp.lt.f32.partialorder %v1992_v19, 0.0004427343  ;;  %v4377_v49 = vpop.permute.xlu0 %3003 }
 0x1f6   :  { %v3230_v56 = vpop.eup %3229  ;;  %vm4362_vm9 = vcmp.lt.f32.partialorder %v1911_v53, 0.0004427343  ;;  %v2007_v11 = vmul.f32 -0.5, %v4318_v0  ;;  %v1944_v46 = vmul.f32 -0.5, %v4306_v9  ;;  %v1959_v5 = vadd.f32 1.0, %v4311_v44 }
 0x1f7   :  { %2159 = vrot.lane.b32.xlu0 %v2072_v2, %s3385_s22  ;;  %v3232_v15 = vpop.eup %3231  ;;  %3073 = vrot.lane.b32.xlu1 %v4302_v18, %s3384_s3  ;;  %v1895_v21 = vsel %vm4352_vm7, %v1892_v31, %v1889_v4  ;;  %v1988_v2 = vmul.f32 0.6931472, %v3230_v56  ;;  %v1910_v53 = vmul.f32 %v4280_v58, %v1909_v34  ;;  %v1927_v12 = vadd.f32 1.0, %v1926_v22 }
 0x1f8   :  { %v1907_v19 = vmul.f32 0.6931472, %v3232_v15  ;;  %v1929_v59 = vand.u32 2147483647, %v4290_v36  ;;  %v4375_v47 = vpop.eup %3233  ;;  %v2063_v18 = vadd.f32 %v1895_v21, %v1179_v24  ;;  %v2010_v31 = vand.u32 2147483647, %v4318_v0 }
 0x1f9   :  { %v1994_v4 = vsel %vm4358_vm8, %v1991_v32, %v1988_v2  ;;  %3241 = vlog2.f32 %v1959_v5  ;;  %v4856_v13 = vmax.f32 %v4135_v7, 0.0  ;;  %v2008_v58 = vadd.f32 1.0, %v2007_v11  ;;  %v4396_v11 = vpop.permute.xlu0 %3008 }
 0x1fa   :  { %v1913_v34 = vsel %vm4362_vm9, %v1910_v53, %v1907_v19  ;;  %v2022_v22 = vadd.f32 1.0, %v4339_v50  ;;  %v2598_v15 = vmul.f32 -1.442695, %v3883_v41  ;;  %3243 = vpow2.f32 %v1757_v57 }
 0x1fb   :  { %v2074_v56 = vadd.f32 %v1994_v4, %v4856_v13  ;;  %2141 = vrot.lane.b32.xlu1 %v2063_v18, %s3385_s22  ;;  %v1945_v21 = vadd.f32 1.0, %v1944_v46  ;;  %v3236_v55 = vpop.eup %3235  ;;  %v1947_v32 = vand.u32 2147483647, %v4306_v9  ;;  %v1962_v2 = vmul.f32 -0.5, %v4311_v44 }
 0x1fc   :  { %3245 = vlog2.f32 %v2022_v22  ;;  %v1977_v27 = vadd.f32 1.0, %v4330_v35  ;;  %v4857_v41 = vmax.f32 %v4022_v26, 0.0  ;;  %v1925_v5 = vmul.f32 0.6931472, %v3236_v55 }
 0x1fd   :  { %2163 = vrot.lane.b32.xlu0 %v2074_v56, %s3385_s22  ;;  %3247 = vpow2.f32 %v4315_v29  ;;  %v1928_v46 = vmul.f32 %v4290_v36, %v1927_v12  ;;  %vm1930_vm10 = vcmp.lt.f32.partialorder %v1929_v59, 0.0004427343  ;;  %v2009_v53 = vmul.f32 %v4318_v0, %v2008_v58  ;;  %v4414_v59 = vpop.permute.xlu0 %3013 }
 0x1fe   :  { %v2065_v57 = vadd.f32 %v1913_v34, %v4857_v41  ;;  %v3238_v19 = vpop.eup %3237  ;;  %vm4402_vm11 = vcmp.lt.f32.partialorder %v2010_v31, 0.0004427343  ;;  %3249 = vlog2.f32 %v1977_v27  ;;  %v1946_v56 = vmul.f32 %v4306_v9, %v1945_v21 }
 0x1ff   :  { %v3240_v4 = vpop.eup %3239  ;;  %v1931_v29 = vsel %vm1930_vm10, %v1928_v46, %v1925_v5  ;;  %v2006_v13 = vmul.f32 0.6931472, %v3238_v19  ;;  %v2025_v34 = vmul.f32 -0.5, %v4339_v50  ;;  %vm4409_vm12 = vcmp.lt.f32.partialorder %v1947_v32, 0.0004427343 }
 0x200   :  { %2145 = vrot.lane.b32.xlu1 %v2065_v57, %s3385_s22  ;;  %v1943_v22 = vmul.f32 0.6931472, %v3240_v4  ;;  %v1963_v0 = vadd.f32 1.0, %v1962_v2  ;;  %v1980_v12 = vmul.f32 -0.5, %v4330_v35  ;;  %v4862_v31 = vmax.f32 %v4051_v33, 0.0 }
 0x201   :  { %v2012_v55 = vsel %vm4402_vm11, %v2009_v53, %v2006_v13  ;;  %v1965_v9 = vand.u32 2147483647, %v4311_v44  ;;  %v1995_v21 = vadd.f32 1.0, %v4335_v52  ;;  %3251 = vpow2.f32 %v2598_v15  ;;  %v4435_v13 = vpop.permute.xlu0 %3018 }
 0x202   :  { %v2067_v58 = vadd.f32 %v1931_v29, %v4862_v31  ;;  %v4863_v32 = vmax.f32 %v4198_v37, 0.0  ;;  %v1949_v2 = vsel %vm4409_vm12, %v1946_v56, %v1943_v22  ;;  %v2040_v41 = vadd.f32 1.0, %v4375_v47 }
 0x203   :  { %v3242_v57 = vpop.eup %3241  ;;  %v2026_v5 = vadd.f32 1.0, %v2025_v34  ;;  %v2028_v46 = vand.u32 2147483647, %v4339_v50  ;;  %3253 = vlog2.f32 %v1995_v21  ;;  %v1964_v15 = vmul.f32 %v4311_v44, %v1963_v0 }
 0x204   :  { %v2076_v27 = vadd.f32 %v2012_v55, %v4863_v32  ;;  %2149 = vrot.lane.b32.xlu1 %v2067_v58, %s3385_s22  ;;  %v1961_v19 = vmul.f32 0.6931472, %v3242_v57  ;;  %v1981_v53 = vadd.f32 1.0, %v1980_v12  ;;  %3255 = vlog2.f32 %v2040_v41  ;;  %v4431_v18 = vpop.eup %3243 }
 0x205   :  { %v4864_v4 = vmax.f32 %v4081_v48, 0.0  ;;  %vm4437_vm13 = vcmp.lt.f32.partialorder %v1965_v9, 0.0004427343  ;;  %v2013_v34 = vadd.f32 1.0, %v4349_v17  ;;  %v1983_v44 = vand.u32 2147483647, %v4330_v35 }
 0x206   :  { %2167 = vrot.lane.b32.xlu0 %v2076_v27, %s3385_s22  ;;  %v3246_v22 = vpop.eup %3245  ;;  %v1967_v36 = vsel %vm4437_vm13, %v1964_v15, %v1961_v19  ;;  %v1998_v0 = vmul.f32 -0.5, %v4335_v52  ;;  %v2027_v58 = vmul.f32 %v4339_v50, %v2026_v5  ;;  %v2043_v55 = vmul.f32 -0.5, %v4375_v47  ;;  %v4454_v15 = vpop.permute.xlu0 %3023 }
 0x207   :  { %v2069_v29 = vadd.f32 %v1949_v2, %v4864_v4  ;;  %v3248_v12 = vpop.eup %3247  ;;  %v2024_v31 = vmul.f32 0.6931472, %v3246_v22  ;;  %3257 = vlog2.f32 %v2013_v34  ;;  %v1538_v21 = vadd.f32 1.0, %v4145_v25 }
 0x208   :  { %v3250_v9 = vpop.eup %3249  ;;  %v1537_v32 = vadd.f32 1.0, %v4161_v40  ;;  %vm2029_vm14 = vcmp.lt.f32.partialorder %v2028_v46, 0.0004427343  ;;  %v1982_v27 = vmul.f32 %v4330_v35, %v1981_v53  ;;  %v4867_v2 = vmax.f32 %v4120_v42, 0.0 }
 0x209   :  { %2153 = vrot.lane.b32.xlu1 %v2069_v29, %s3385_s22  ;;  %v2030_v57 = vsel %vm2029_vm14, %v2027_v58, %v2024_v31  ;;  %v1979_v19 = vmul.f32 0.6931472, %v3250_v9  ;;  %v2031_v50 = vadd.f32 1.0, %v4431_v18  ;;  %v4868_v5 = vmax.f32 %v4233_v30, 0.0 }
 0x20a   :  { %v2071_v41 = vadd.f32 %v1967_v36, %v4867_v2  ;;  %vm1984_vm15 = vcmp.lt.f32.partialorder %v1983_v44, 0.0004427343  ;;  %v1999_v29 = vadd.f32 1.0, %v1998_v0  ;;  %v2016_v25 = vmul.f32 -0.5, %v4349_v17  ;;  %v4466_v0 = vpop.permute.xlu0 %3028 }
 0x20b   :  { %v2078_v4 = vadd.f32 %v2030_v57, %v4868_v5  ;;  %v1985_v40 = vsel %vm1984_vm15, %v1982_v27, %v1979_v19  ;;  %v2001_v35 = vand.u32 2147483647, %v4335_v52  ;;  %v2044_v46 = vadd.f32 1.0, %v2043_v55  ;;  %v3252_v53 = vpop.eup %3251 }
 0x20c   :  { %3259 = vlog2.f32 %v2031_v50  ;;  %v2046_v56 = vand.u32 2147483647, %v4375_v47  ;;  %v1540_v22 = vadd.f32 1.0, %v3248_v12  ;;  %v4869_v36 = vmax.f32 %v4138_v39, 0.0 }
 0x20d   :  { %2157 = vrot.lane.b32.xlu1 %v2071_v41, %s3385_s22  ;;  %3261 = vrcp.f32 %v1538_v21  ;;  %2171 = vrot.lane.b32.xlu0 %v2078_v4, %s3385_s22  ;;  %v3254_v34 = vpop.eup %3253  ;;  %v2000_v9 = vmul.f32 %v4335_v52, %v1999_v29  ;;  %v2017_v55 = vadd.f32 1.0, %v2016_v25  ;;  %v2034_v27 = vmul.f32 -0.5, %v4431_v18 }
 0x20e   :  { %3263 = vrcp.f32 %v1537_v32  ;;  %v2073_v44 = vadd.f32 %v1985_v40, %v4869_v36  ;;  %v3256_v31 = vpop.eup %3255  ;;  %v1997_v58 = vmul.f32 0.6931472, %v3254_v34  ;;  %vm2002_vm1 = vcmp.lt.f32.partialorder %v2001_v35, 0.0004427343  ;;  %v4477_v29 = vpop.permute.xlu0 %3033 }
 0x20f   :  { %v2042_v21 = vmul.f32 0.6931472, %v3256_v31  ;;  %v2045_v2 = vmul.f32 %v4375_v47, %v2044_v46  ;;  %v2019_v12 = vand.u32 2147483647, %v4349_v17  ;;  %v1539_v32 = vadd.f32 1.0, %v3252_v53 }
 0x210   :  { %v3006_v41 = vunpack.i.h.bf16 %v4377_v49  ;;  %v2003_v57 = vsel %vm2002_vm1, %v2000_v9, %v1997_v58  ;;  %vm2047_vm2 = vcmp.lt.f32.partialorder %v2046_v56, 0.0004427343  ;;  %v3005_v50 = vunpack.i.l.bf16 %v4377_v49 }
 0x211   :  { %2161 = vrot.lane.b32.xlu1 %v2073_v44, %s3385_s22  ;;  %v3258_v19 = vpop.eup %3257  ;;  %v4870_v52 = vmax.f32 %v4190_v61, 0.0  ;;  %v2048_v4 = vsel %vm2047_vm2, %v2045_v2, %v2042_v21  ;;  %vm1300_vm3 = vcmask 523264   ;;  %v4871_v25 = vmax.f32 %v4257_v45, 0.0 }
 0x212   :  { %v2015_v40 = vmul.f32 0.6931472, %v3258_v19  ;;  %v2018_v35 = vmul.f32 %v4349_v17, %v2017_v55  ;;  %v2035_v46 = vadd.f32 1.0, %v2034_v27  ;;  %vm2020_vm4 = vcmp.lt.f32.partialorder %v2019_v12, 0.0004427343  ;;  %vm4487_vm0 = vmpackc.low %vm1300_vm3, %vm1300_vm3 }
 0x213   :  { %v2075_v5 = vadd.f32 %v2003_v57, %v4870_v52  ;;  %v2080_v47 = vadd.f32 %v2048_v4, %v4871_v25  ;;  %v2037_v49 = vand.u32 2147483647, %v4431_v18  ;;  %3265 = vrcp.f32 %v1540_v22  ;;  %v2116_v22 = vpop.permute.xlu0 %2115 }
 0x214   :  { %v2021_v36 = vsel %vm2020_vm4, %v2018_v35, %v2015_v40  ;;  %v4874_v17 = vmax.f32 %v4227_v62, 0.0  ;;  %v2883_v27 = vpack.c.bf16 %v3006_v41, %v3005_v50  ;;  %v4875_v21 = vmax.f32 %v4034_v16, 0.0 }
 0x215   :  { %2165 = vrot.lane.b32.xlu1 %v2075_v5, %s3385_s22  ;;  %2175 = vrot.lane.b32.xlu0 %v2080_v47, %s3385_s22  ;;  %v2036_v57 = vmul.f32 %v4431_v18, %v2035_v46  ;;  %3267 = vrcp.f32 %v1539_v32  ;;  %vm2038_vm5 = vcmp.lt.f32.partialorder %v2037_v49, 0.0004427343  ;;  %v2601_v52 = vmul.f32 -1.442695, %v3894_v10 }
 0x216   :  { %v3260_v31 = vpop.eup %3259  ;;  %v2077_v58 = vadd.f32 %v2021_v36, %v4874_v17  ;;  %v3077_v2 = vpack.i.bf16 %v4875_v21, %v1179_v24  ;;  %v2600_v24 = vmul.f32 -1.442695, %v3897_v60  ;;  %v4876_v18 = vmax.f32 %v4269_v1, 0.0 }
 0x217   :  { %v3262_v55 = vpop.eup %3261  ;;  %v2033_v12 = vmul.f32 0.6931472, %v3260_v31  ;;  %3269 = vpow2.f32 %v2601_v52  ;;  %v3011_v25 = vunpack.i.h.bf16 %v4396_v11  ;;  %v3010_v47 = vunpack.i.l.bf16 %v4396_v11 }
 0x218   :  { %v3264_v19 = vpop.eup %3263  ;;  %v4508_v5 = vmul.f32 %v3262_v55, %v2116_v22  ;;  %3271 = vpow2.f32 %v2600_v24  ;;  %vm2384_vm6 = vcmask 261120  }
 0x219   :  { %v3039_v53 = vpop.permute.xlu1 %3038  ;;  %2169 = vrot.lane.b32.xlu1 %v2077_v58, %s3385_s22  ;;  %3078 = vrot.lane.b32.xlu0 %v3077_v2, %s3384_s3  ;;  %v2039_v41 = vsel %vm2038_vm5, %v2036_v57, %v2033_v12  ;;  %v3016_v2 = vunpack.i.h.bf16 %v4414_v59  ;;  %v3015_v12 = vunpack.i.l.bf16 %v4414_v59 }
 0x21a   :  { %v3041_v56 = vunpack.i.h.bf16 %v3039_v53  ;;  %v3040_v34 = vunpack.i.l.bf16 %v3039_v53  ;;  %v2079_v32 = vadd.f32 %v2039_v41, %v4876_v18  ;;  %v2120_v53 = vpop.permute.xlu0 %2119 }
 0x21b   :  { %v2895_v24 = vpack.c.bf16 %v3016_v2, %v3015_v12 }
 0x21c   :  { %v2880_v9 = vpack.c.bf16 %v3041_v56, %v3040_v34  ;;  %v2889_v34 = vpack.c.bf16 %v3011_v25, %v3010_v47 }
 0x21d   :  { %2173 = vrot.lane.b32.xlu1 %v2079_v32, %s3385_s22  ;;  %v3266_v46 = vpop.eup %3265 }
 0x21e   :  { %2882 = vmatprep.subr.msk.bf16.mxu0 %vm4487_vm0, %v2880_v9  ;;  %v2114_v50 = vpop.permute.xlu1 %2113  ;;  %v4517_v31 = vmul.f32 %v3266_v46, %v2120_v53  ;;  %v2603_v9 = vmul.f32 -1.442695, %v3908_v3  ;;  %v2605_v3 = vmul.f32 -1.442695, %v3924_v14  ;;  %v2124_v32 = vpop.permute.xlu0 %2123  ;;  %v2607_v46 = vmul.f32 -1.442695, %v3945_v6 }
 0x21f   :  { %2885 = vmatpush3.bf16.xpose.msk.msra.mxu0 %vm4487_vm0, %v2883_v27  ;;  %v4510_v4 = vmul.f32 %v3264_v19, %v2114_v50  ;;  %v3268_v56 = vpop.eup %3267  ;;  %v2602_v27 = vmul.f32 -1.442695, %v3911_v51  ;;  %v2604_v51 = vmul.f32 -1.442695, %v3928_v8  ;;  %v2606_v8 = vmul.f32 -1.442695, %v3949_v23 }
 0x220   :  { %3273 = vpow2.f32 %v2603_v9  ;;  %v2609_v23 = vmul.f32 -1.442695, %v3964_v63  ;;  %v4881_v63 = vld [vmem:[#allocation19_spill] sm:$0xff] }
 0x221   :  { %v2930_v10 = vpack.c.bf16 %v4508_v5, %v4510_v4  ;;  %v3270_v58 = vpop.eup %3269  ;;  %3275 = vpow2.f32 %v2602_v27 }
 0x222   :  { %v3044_v60 = vpop.permute.xlu1 %3043  ;;  %v3272_v55 = vpop.eup %3271  ;;  %v1542_v21 = vadd.f32 1.0, %v3270_v58 }
 0x223   :  { %v3046_v40 = vunpack.i.h.bf16 %v3044_v60  ;;  %v3045_v35 = vunpack.i.l.bf16 %v3044_v60  ;;  %v1541_v19 = vadd.f32 1.0, %v3272_v55  ;;  %v2128_v12 = vpop.permute.xlu0 %2127 }
 0x224   :  { %3277 = vrcp.f32 %v1542_v21 }
 0x225   :  { %v2886_v49 = vpack.c.bf16 %v3046_v40, %v3045_v35  ;;  %3279 = vrcp.f32 %v1541_v19  ;;  %v4878_v19 = vld [vmem:[#allocation18_spill] sm:$0xff] }
 0x226   :  { %v2118_v36 = vpop.permute.xlu1 %2117  ;;  %3281 = vpow2.f32 %v2605_v3 }
 0x227   :  { %v4519_v17 = vmul.f32 %v3268_v56, %v2118_v36  ;;  %2888 = vmatprep.subr.msk.bf16.mxu0 %vm4487_vm0, %v2886_v49  ;;  %3283 = vpow2.f32 %v2604_v51  ;;  %v3021_v56 = vunpack.i.h.bf16 %v4435_v13 }
 0x228   :  { %2891 = vmatpush3.bf16.xpose.msk.msra.mxu0 %vm4487_vm0, %v2889_v34  ;;  %v3020_v34 = vunpack.i.l.bf16 %v4435_v13  ;;  %v2608_v13 = vmul.f32 -1.442695, %v3968_v28 }
 0x229   :  { %v2934_v11 = vpack.c.bf16 %v4517_v31, %v4519_v17 }
 0x22a   :  { %v3049_v57 = vpop.permute.xlu1 %3048  ;;  %v3274_v59 = vpop.eup %3273  ;;  %v2901_v2 = vpack.c.bf16 %v3021_v56, %v3020_v34 }
 0x22b   :  { %v3051_v22 = vunpack.i.h.bf16 %v3049_v57  ;;  %v3050_v52 = vunpack.i.l.bf16 %v3049_v57  ;;  %v3276_v18 = vpop.eup %3275  ;;  %v1544_v25 = vadd.f32 1.0, %v3274_v59  ;;  %v4877_v57 = vld [vmem:[#allocation3_spill] sm:$0xff]  ;;  %v2132_v34 = vpop.permute.xlu0 %2131 }
 0x22c   :  { %v1543_v60 = vadd.f32 1.0, %v3276_v18  ;;  %v4880_v18 = vld [vmem:[#allocation2_spill] sm:$0xff] }
 0x22d   :  { %v2892_v41 = vpack.c.bf16 %v3051_v22, %v3050_v52  ;;  %3285 = vrcp.f32 %v1544_v25  ;;  %v4879_v22 = vpack.i.bf16 %v4877_v57, %v4878_v19  ;;  %v3026_v25 = vunpack.i.h.bf16 %v4454_v15  ;;  %v4886_v57 = vld [vmem:[#allocation5_spill] sm:$0xff] }
 0x22e   :  { %v3278_v50 = vpop.eup %3277  ;;  %3287 = vrcp.f32 %v1543_v60  ;;  %v4887_v19 = vld [vmem:[#allocation21_spill] sm:$0xff] }
 0x22f   :  { %2894 = vmatprep.subr.msk.bf16.mxu0 %vm4487_vm0, %v2892_v41  ;;  %v3280_v47 = vpop.eup %3279  ;;  %v4537_v35 = vmul.f32 %v3278_v50, %v2124_v32  ;;  %3289 = vpow2.f32 %v2607_v46  ;;  %v4882_v32 = vpack.i.bf16 %v4880_v18, %v4881_v63  ;;  %v3030_v18 = vunpack.i.l.bf16 %v4466_v0 }
 0x230   :  { %2897 = vmatpush3.bf16.xpose.msk.msra.mxu0 %vm4487_vm0, %v2895_v24  ;;  %v3282_v49 = vpop.eup %3281  ;;  %3291 = vpow2.f32 %v2606_v8 }
 0x231   :  { %v3284_v58 = vpop.eup %3283  ;;  %v1546_v27 = vadd.f32 1.0, %v3282_v49 }
 0x232   :  { %v1545_v21 = vadd.f32 1.0, %v3284_v58  ;;  %v4884_v58 = vld [vmem:[#allocation20_spill] sm:$0xff] }
 0x233   :  { %3293 = vrcp.f32 %v1546_v27  ;;  %v1198_v27 = vld [vmem:[%s4724_s5] sm:$0xff] }
 0x234   :  { %3295 = vrcp.f32 %v1545_v21  ;;  %1201 = vperm.xlu0 %3124, %v1198_v27  }
 0x235   :  { %3297 = vpow2.f32 %v2609_v23  ;;  %v2613_v23 = vmul.f32 -1.442695, %v4017_v54 }
 0x236   :  { %3299 = vpow2.f32 %v2608_v13 }
 0x237   :  { %v3286_v52 = vpop.eup %3285 }
 0x238   :  { %v3288_v41 = vpop.eup %3287  ;;  %v4556_v3 = vmul.f32 %v3286_v52, %v2128_v12 }
 0x239   :  { %v2122_v40 = vpop.permute.xlu1 %2121  ;;  %v3290_v59 = vpop.eup %3289 }
 0x23a   :  { %v4539_v14 = vmul.f32 %v3280_v47, %v2122_v40  ;;  %v3292_v28 = vpop.eup %3291  ;;  %v3025_v47 = vunpack.i.l.bf16 %v4454_v15  ;;  %v4570_v40 = vld [vmem:[%s4723_s4] sm:$0xff]  ;;  %v1548_v46 = vadd.f32 1.0, %v3290_v59  ;;  %v3031_v59 = vunpack.i.h.bf16 %v4466_v0 }
 0x23b   :  { %2728 = vmatprep.mubr.msk.f32.mxu0 %vm1300_vm3, %v4570_v40  ;;  %v1547_v56 = vadd.f32 1.0, %v3292_v28 }
 0x23c   :  { %v2938_v53 = vpack.c.bf16 %v4537_v35, %v4539_v14  ;;  %v2907_v21 = vpack.c.bf16 %v3026_v25, %v3025_v47  ;;  %3301 = vrcp.f32 %v1548_v46  ;;  %v4890_v46 = vld [vmem:[#allocation22_spill] sm:$0xff] }
 0x23d   :  { %v3054_v36 = vpop.permute.xlu1 %3053  ;;  %3303 = vrcp.f32 %v1547_v56 }
 0x23e   :  { %v3056_v9 = vunpack.i.h.bf16 %v3054_v36  ;;  %v3055_v55 = vunpack.i.l.bf16 %v3054_v36  ;;  %v4883_v36 = vld [vmem:[#allocation4_spill] sm:$0xff]  ;;  %3305 = vpow2.f32 %v2613_v23 }
 0x240   :  { %v2898_v6 = vpack.c.bf16 %v3056_v9, %v3055_v55  ;;  %v4885_v9 = vpack.i.bf16 %v4883_v36, %v4884_v58  ;;  %v3294_v55 = vpop.eup %3293  ;;  %v4892_v36 = vld [vmem:[#allocation34_spill] sm:$0xff]  ;;  %v4893_v58 = vld [vmem:[#allocation7_spill] sm:$0xff] }
 0x241   :  { %v4581_v13 = vmul.f32 %v3294_v55, %v2132_v34  ;;  %v2913_v34 = vpack.c.bf16 %v3031_v59, %v3030_v18  ;;  %v2617_v0 = vmul.f32 -1.442695, %v4892_v36  ;;  %v3036_v59 = vunpack.i.h.bf16 %v4477_v29 }
 0x242   :  { %2900 = vmatprep.subr.msk.bf16.mxu0 %vm4487_vm0, %v2898_v6  ;;  %v3296_v6 = vpop.eup %3295 }
 0x243   :  { %2903 = vmatpush3.bf16.xpose.msk.msra.mxu0 %vm4487_vm0, %v2901_v2  ;;  %v3298_v52 = vpop.eup %3297 }
 0x244   :  { %v3300_v54 = vpop.eup %3299  ;;  %v1550_v47 = vadd.f32 1.0, %v3298_v52 }
 0x246   :  { %3083 = vxpose.xlu1.b32.start [1/16] (narrow) %v4879_v22, 16  ;;  %v2126_v24 = vpop.permute.xlu1 %2125  ;;  %v4888_v22 = vpack.i.bf16 %v4886_v57, %v4887_v19  ;;  %v4896_v57 = vld [vmem:[#allocation8_spill] sm:$0xff] }
 0x247   :  { %v4558_v51 = vmul.f32 %v3288_v41, %v2126_v24  ;;  %v2612_v24 = vmul.f32 -1.442695, %v4022_v26  ;;  %v2614_v26 = vmul.f32 -1.442695, %v4051_v33  ;;  %v2616_v33 = vmul.f32 -1.442695, %v4081_v48 }
 0x248   :  { %v4897_v19 = vld [vmem:[#allocation24_spill] sm:$0xff]  ;;  %v2618_v48 = vmul.f32 -1.442695, %v4120_v42  ;;  %v2621_v42 = vmul.f32 -1.442695, %v4135_v7 }
 0x249   :  { %v2942_v50 = vpack.c.bf16 %v4556_v3, %v4558_v51  ;;  %3307 = vpow2.f32 %v2612_v24 }
 0x24a   :  { %3085 = vxpose.xlu1.b32.cont [2/16] (narrow) %v4882_v32, 16  ;;  %v3059_v60 = vpop.permute.xlu1 %3058  ;;  %v2615_v32 = vmul.f32 -1.442695, %v4056_v20  ;;  %v2136_v20 = vpop.permute.xlu0 %2135 }
 0x24b   :  { %v3061_v8 = vunpack.i.h.bf16 %v3059_v60  ;;  %v3060_v49 = vunpack.i.l.bf16 %v3059_v60  ;;  %v4889_v60 = vld [vmem:[#allocation6_spill] sm:$0xff] }
 0x24c   :  { %3309 = vpow2.f32 %v2615_v32 }
 0x24d   :  { %v2904_v15 = vpack.c.bf16 %v3061_v8, %v3060_v49  ;;  %v4891_v8 = vpack.i.bf16 %v4889_v60, %v4890_v46  ;;  %v1549_v49 = vadd.f32 1.0, %v3300_v54  ;;  %3311 = vrcp.f32 %v1550_v47  ;;  %v4899_v60 = vld [vmem:[#allocation9_spill] sm:$0xff] }
 0x24e   :  { %3087 = vxpose.xlu1.b32.cont [3/16] (narrow) %v4885_v9, 16  ;;  %v4894_v9 = vld [vmem:[#allocation23_spill] sm:$0xff]  ;;  %v2611_v54 = vmul.f32 -1.442695, %v4034_v16  ;;  %v4900_v16 = vld [vmem:[#allocation25_spill] sm:$0xff] }
 0x24f   :  { %v2130_v2 = vpop.permute.xlu1 %2129  ;;  %2906 = vmatprep.subr.msk.bf16.mxu0 %vm4487_vm0, %v2904_v15  ;;  %v4895_v55 = vpack.i.bf16 %v4893_v58, %v4894_v9  ;;  %v3302_v15 = vpop.eup %3301  ;;  %3313 = vrcp.f32 %v1549_v49  ;;  %v4901_v46 = vpack.i.bf16 %v4899_v60, %v4900_v16  ;;  %v4902_v58 = vld [vmem:[#allocation10_spill] sm:$0xff] }
 0x250   :  { %v4583_v12 = vmul.f32 %v3296_v6, %v2130_v2  ;;  %2909 = vmatpush3.bf16.xpose.msk.msra.mxu0 %vm4487_vm0, %v2907_v21  ;;  %v3304_v27 = vpop.eup %3303  ;;  %3315 = vpow2.f32 %v2614_v26  ;;  %v2619_v21 = vmul.f32 -1.442695, %v4117_v38  ;;  %v4612_v2 = vmul.f32 %v3302_v15, %v2136_v20  ;;  %v4903_v9 = vld [vmem:[#allocation26_spill] sm:$0xff] }
 0x251   :  { %3317 = vpow2.f32 %v2617_v0  ;;  %v3306_v52 = vpop.eup %3305  ;;  %v3035_v38 = vunpack.i.l.bf16 %v4477_v29  ;;  %v2620_v29 = vmul.f32 -1.442695, %v4138_v39  ;;  %v2623_v39 = vmul.f32 -1.442695, %v4198_v37  ;;  %v4906_v37 = vld [vmem:[#allocation27_spill] sm:$0xff] }
 0x252   :  { %3089 = vxpose.xlu1.b32.cont [4/16] (narrow) %v4888_v22, 16  ;;  %v2946_v41 = vpack.c.bf16 %v4581_v13, %v4583_v12  ;;  %v4898_v22 = vpack.i.bf16 %v4896_v57, %v4897_v19  ;;  %3319 = vpow2.f32 %v2616_v33  ;;  %v1554_v47 = vadd.f32 1.0, %v3306_v52 }
 0x253   :  { %v3064_v63 = vpop.permute.xlu1 %3063  ;;  %3321 = vpow2.f32 %v2619_v21  ;;  %v2919_v26 = vpack.c.bf16 %v3036_v59, %v3035_v38 }
 0x254   :  { %v3066_v28 = vunpack.i.h.bf16 %v3064_v63  ;;  %v3065_v25 = vunpack.i.l.bf16 %v3064_v63  ;;  %v2610_v63 = vmul.f32 -1.442695, %v4126_v43  ;;  %3323 = vpow2.f32 %v2611_v54  ;;  %v2140_v43 = vpop.permute.xlu0 %2139  ;;  %v4905_v54 = vld [vmem:[#allocation11_spill] sm:$0xff] }
 0x255   :  { %3325 = vpow2.f32 %v2618_v48  ;;  %v4907_v48 = vpack.i.bf16 %v4905_v54, %v4906_v37  ;;  %v4914_v37 = vld [vmem:[#allocation14_spill] sm:$0xff] }
 0x256   :  { %3091 = vxpose.xlu1.b32.cont [5/16] (narrow) %v4891_v8, 16  ;;  %v2910_v56 = vpack.c.bf16 %v3066_v28, %v3065_v25  ;;  %v3308_v25 = vpop.eup %3307  ;;  %3327 = vpow2.f32 %v2610_v63 }
 0x257   :  { %v3310_v8 = vpop.eup %3309  ;;  %v1553_v36 = vadd.f32 1.0, %v3308_v25  ;;  %3329 = vrcp.f32 %v1554_v47 }
 0x258   :  { %2912 = vmatprep.subr.msk.bf16.mxu0 %vm4487_vm0, %v2910_v56  ;;  %v3312_v56 = vpop.eup %3311  ;;  %v1556_v20 = vadd.f32 1.0, %v3310_v8  ;;  %3331 = vpow2.f32 %v2621_v42  ;;  %v4908_v8 = vld [vmem:[#allocation12_spill] sm:$0xff] }
 0x259   :  { %2915 = vmatpush3.bf16.xpose.msk.msra.mxu0 %vm4487_vm0, %v2913_v34  ;;  %v3314_v34 = vpop.eup %3313  ;;  %3333 = vpow2.f32 %v2620_v29  ;;  %v4640_v33 = vmul.f32 %v3312_v56, %v2140_v43  ;;  %v4909_v42 = vld [vmem:[#allocation28_spill] sm:$0xff]  ;;  %v2627_v56 = vmul.f32 -1.442695, %v4257_v45 }
 0x25a   :  { %3093 = vxpose.xlu1.b32.cont [6/16] (narrow) %v4895_v55, 16  ;;  %v3316_v0 = vpop.eup %3315  ;;  %v4904_v55 = vpack.i.bf16 %v4902_v58, %v4903_v9  ;;  %3335 = vrcp.f32 %v1553_v36  ;;  %v4912_v58 = vld [vmem:[#allocation29_spill] sm:$0xff] }
 0x25b   :  { %v2134_v6 = vpop.permute.xlu1 %2133  ;;  %v3318_v7 = vpop.eup %3317  ;;  %v1555_v57 = vadd.f32 1.0, %v3316_v0  ;;  %3337 = vrcp.f32 %v1556_v20  ;;  %v4911_v20 = vld [vmem:[#allocation13_spill] sm:$0xff] }
 0x25c   :  { %v4614_v23 = vmul.f32 %v3304_v27, %v2134_v6  ;;  %v2622_v27 = vmul.f32 -1.442695, %v4190_v61  ;;  %v4642_v6 = vpop.permute.xlu0 %2143  ;;  %v3320_v19 = vpop.eup %3319  ;;  %3339 = vpow2.f32 %v2623_v39  ;;  %v2625_v61 = vmul.f32 -1.442695, %v4233_v30 }
 0x25d   :  { %v3322_v59 = vpop.eup %3321  ;;  %v1557_v47 = vadd.f32 1.0, %v3320_v19  ;;  %v4913_v9 = vpack.i.bf16 %v4911_v20, %v4912_v58 }
 0x25e   :  { %3095 = vxpose.xlu1.b32.cont [7/16] (narrow) %v4898_v22, 16  ;;  %v2950_v24 = vpack.c.bf16 %v4612_v2, %v4614_v23  ;;  %v1558_v22 = vadd.f32 1.0, %v3318_v7  ;;  %3341 = vpow2.f32 %v2622_v27  ;;  %v4653_v25 = vpop.eup %3323  ;;  %v1560_v16 = vadd.f32 1.0, %v3322_v59 }
 0x25f   :  { %v3069_v18 = vpop.permute.xlu1 %3068  ;;  %3343 = vrcp.f32 %v1555_v57  ;;  %v3326_v60 = vpop.eup %3325  ;;  %v1552_v17 = vadd.f32 1.0, %v4653_v25 }
 0x260   :  { %v3071_v32 = vunpack.i.h.bf16 %v3069_v18  ;;  %v3070_v28 = vunpack.i.l.bf16 %v3069_v18  ;;  %v2624_v18 = vmul.f32 -1.442695, %v4227_v62  ;;  %v2148_v63 = vpop.permute.xlu0 %2147  ;;  %3345 = vrcp.f32 %v1558_v22  ;;  %v3328_v30 = vpop.eup %3327 }
 0x261   :  { %3347 = vpow2.f32 %v2625_v61  ;;  %v3330_v29 = vpop.eup %3329  ;;  %v1559_v36 = vadd.f32 1.0, %v3326_v60 }
 0x262   :  { %3097 = vxpose.xlu1.b32.cont [8/16] (narrow) %v4901_v46, 16  ;;  %v2916_v49 = vpack.c.bf16 %v3071_v32, %v3070_v28  ;;  %3349 = vpow2.f32 %v2624_v18 }
 0x263   :  { %3351 = vrcp.f32 %v1557_v47 }
 0x264   :  { %2918 = vmatprep.subr.msk.bf16.mxu0 %vm4487_vm0, %v2916_v49  ;;  %v4910_v49 = vpack.i.bf16 %v4908_v8, %v4909_v42  ;;  %v2152_v43 = vpop.permute.xlu0 %2151  ;;  %3353 = vrcp.f32 %v1560_v16  ;;  %v4917_v42 = vld [vmem:[#allocation15_spill] sm:$0xff] }
 0x265   :  { %2921 = vmatpush3.bf16.xpose.msk.msra.mxu0 %vm4487_vm0, %v2919_v26  ;;  %v2138_v15 = vpop.permute.xlu1 %2137  ;;  %v2626_v26 = vmul.f32 -1.442695, %v4269_v1  ;;  %3355 = vpow2.f32 %v2627_v56  ;;  %v2226_v1 = vmul.f32 %v3330_v29, %v2148_v63 }
 0x266   :  { %3099 = vxpose.xlu1.b32.cont [9/16] (narrow) %v4904_v55, 16  ;;  %v4644_v21 = vmul.f32 %v3314_v34, %v2138_v15  ;;  %v3332_v34 = vpop.eup %3331 }
 0x267   :  { %v3334_v0 = vpop.eup %3333  ;;  %v1562_v39 = vadd.f32 1.0, %v3332_v34  ;;  %3357 = vpow2.f32 %v2626_v26 }
 0x268   :  { %v2954_v52 = vpack.c.bf16 %v4640_v33, %v4644_v21  ;;  %v3336_v45 = vpop.eup %3335  ;;  %v2156_v15 = vpop.permute.xlu0 %2155  ;;  %3359 = vrcp.f32 %v1559_v36  ;;  %v1561_v19 = vadd.f32 1.0, %v3334_v0 }
 0x269   :  { %v3074_v38 = vpop.permute.xlu1 %3073  ;;  %v3338_v7 = vpop.eup %3337  ;;  %3361 = vrcp.f32 %v1562_v39  ;;  %v1551_v39 = vadd.f32 1.0, %v3328_v30 }
 0x26a   :  { %3101 = vxpose.xlu1.b32.cont [10/16] (narrow) %v4907_v48, 16  ;;  %v3076_v32 = vunpack.i.h.bf16 %v3074_v38  ;;  %v3075_v28 = vunpack.i.l.bf16 %v3074_v38  ;;  %v3340_v57 = vpop.eup %3339  ;;  %v4915_v48 = vld [vmem:[#allocation30_spill] sm:$0xff]  ;;  %3363 = vrcp.f32 %v1561_v19 }
 0x26b   :  { %v3342_v22 = vpop.eup %3341  ;;  %v4916_v59 = vpack.i.bf16 %v4914_v37, %v4915_v48  ;;  %v4924_v37 = vld [vmem:[#allocation33_spill] sm:$0xff] }
 0x26c   :  { %v2922_v46 = vpack.c.bf16 %v3076_v32, %v3075_v28  ;;  %v3344_v61 = vpop.eup %3343  ;;  %v1564_v32 = vadd.f32 1.0, %v3340_v57  ;;  %v2228_v28 = vmul.f32 %v3338_v7, %v2152_v43  ;;  %v2160_v47 = vpop.permute.xlu0 %2159  ;;  %v1563_v16 = vadd.f32 1.0, %v3342_v22 }
 0x26d   :  { %v4659_v62 = vpop.permute.xlu1 %2141  ;;  %v3346_v18 = vpop.eup %3345 }
 0x26e   :  { %3103 = vxpose.xlu1.b32.cont [11/16] (narrow) %v4910_v49, 16  ;;  %2924 = vmatprep.subr.msk.bf16.mxu0 %vm4487_vm0, %v2922_v46  ;;  %v3348_v63 = vpop.eup %3347  ;;  %v4918_v49 = vld [vmem:[#allocation31_spill] sm:$0xff]  ;;  %3365 = vrcp.f32 %v1564_v32  ;;  %v2230_v36 = vmul.f32 %v3346_v18, %v2156_v15 }
 0x26f   :  { %v3350_v46 = vpop.eup %3349  ;;  %v4919_v56 = vpack.i.bf16 %v4917_v42, %v4918_v49  ;;  %v1566_v43 = vadd.f32 1.0, %v3348_v63  ;;  %3367 = vrcp.f32 %v1563_v16 }
 0x270   :  { %v3352_v29 = vpop.eup %3351  ;;  %v2164_v0 = vpop.permute.xlu0 %2163 }
 0x271   :  { %v3354_v34 = vpop.eup %3353  ;;  %3369 = vrcp.f32 %v1566_v43 }
 0x272   :  { %3105 = vxpose.xlu1.b32.cont [12/16] (narrow) %v4913_v9, 16  ;;  %v2146_v55 = vpop.permute.xlu1 %2145  ;;  %v3356_v58 = vpop.eup %3355  ;;  %v1565_v9 = vadd.f32 1.0, %v3350_v46 }
 0x273   :  { %v2225_v27 = vmul.f32 %v3336_v45, %v2146_v55  ;;  %v3358_v5 = vpop.eup %3357  ;;  %v4921_v45 = vld [vmem:[#allocation32_spill] sm:$0xff]  ;;  %v1568_v15 = vadd.f32 1.0, %v3356_v58 }
 0x274   :  { %v3360_v7 = vpop.eup %3359  ;;  %3371 = vrcp.f32 %v1565_v9  ;;  %v1567_v22 = vadd.f32 1.0, %v3358_v5 }
 0x275   :  { %v2928_v54 = vpack.c.bf16 %v2226_v1, %v2225_v27  ;;  %v2232_v27 = vmul.f32 %v3354_v34, %v2160_v47  ;;  %v3362_v31 = vpop.eup %3361  ;;  %3373 = vrcp.f32 %v1551_v39 }
 0x276   :  { %3107 = vxpose.xlu1.b32.cont [13/16] (narrow) %v4916_v59, 16  ;;  %v2150_v38 = vpop.permute.xlu1 %2149  ;;  %v3364_v48 = vpop.eup %3363  ;;  %3375 = vrcp.f32 %v1568_v15 }
 0x277   :  { %v2227_v60 = vmul.f32 %v3344_v61, %v2150_v38  ;;  %2929 = vmatprep.subr.bf16.mxu1 %v2928_v54  ;;  %v4923_v54 = vld [vmem:[#allocation17_spill] sm:$0xff]  ;;  %v2234_v61 = vmul.f32 %v3362_v31, %v2164_v0  ;;  %3377 = vrcp.f32 %v1567_v22 }
 0x278   :  { %2931 = vmatpush3.bf16.msra.mxu1 %v2930_v10  ;;  %v4920_v10 = vld [vmem:[#allocation16_spill] sm:$0xff]  ;;  %v2168_v57 = vpop.permute.xlu0 %2167  ;;  %v4925_v30 = vpack.i.bf16 %v4923_v54, %v4924_v37  ;;  %v3366_v35 = vpop.eup %3365  ;;  %3379 = vrcp.f32 %v1552_v17 }
 0x279   :  { %v2932_v8 = vpack.c.bf16 %v2228_v28, %v2227_v60  ;;  %v4922_v55 = vpack.i.bf16 %v4920_v10, %v4921_v45  ;;  %v2236_v32 = vmul.f32 %v3366_v35, %v2168_v57 }
 0x27a   :  { %3109 = vxpose.xlu1.b32.cont [14/16] (narrow) %v4919_v56, 16 }
 0x27b   :  { %v2154_v26 = vpop.permute.xlu1 %2153  ;;  %2933 = vmatprep.subr.bf16.mxu1 %v2932_v8 }
 0x27c   :  { %v2229_v20 = vmul.f32 %v3352_v29, %v2154_v26  ;;  %2935 = vmatpush3.bf16.msra.mxu1 %v2934_v11 }
 0x27e   :  { %v2936_v4 = vpack.c.bf16 %v2230_v36, %v2229_v20  ;;  %3111 = vxpose.xlu1.b32.cont [15/16] (narrow) %v4922_v55, 16 }
 0x27f   :  { %v2158_v1 = vpop.permute.xlu1 %2157  ;;  %v2172_v38 = vpop.permute.xlu0 %2171 }
 0x280   :  { %v2231_v19 = vmul.f32 %v3360_v7, %v2158_v1  ;;  %2937 = vmatprep.subr.bf16.mxu1 %v2936_v4 }
 0x281   :  { %2939 = vmatpush3.bf16.msra.mxu1 %v2938_v53  ;;  %v3368_v53 = vpop.eup %3367 }
 0x282   :  { %v2940_v11 = vpack.c.bf16 %v2232_v27, %v2231_v19  ;;  %3113 = vxpose.xlu1.b32.end [16/16] (narrow) %v4925_v30, 16  ;;  %v3370_v60 = vpop.eup %3369 }
 0x283   :  { %v2162_v59 = vpop.permute.xlu1 %2161  ;;  %v3372_v16 = vpop.eup %3371  ;;  %v2238_v8 = vmul.f32 %v3370_v60, %v2172_v38 }
 0x284   :  { %v2233_v18 = vmul.f32 %v3364_v48, %v2162_v59  ;;  %2941 = vmatprep.subr.bf16.mxu1 %v2940_v11 }
 0x285   :  { %2943 = vmatpush3.bf16.msra.mxu1 %v2942_v50  ;;  %v3374_v50 = vpop.eup %3373 }
 0x286   :  { %v2944_v14 = vpack.c.bf16 %v2234_v61, %v2233_v18  ;;  %v3376_v56 = vpop.eup %3375  ;;  %v2223_v13 = vmul.f32 %v3374_v50, %v4659_v62 }
 0x287   :  { %v2166_v25 = vpop.permute.xlu1 %2165  ;;  %v2176_v47 = vpop.permute.xlu0 %2175 }
 0x288   :  { %v2235_v28 = vmul.f32 %v3368_v53, %v2166_v25  ;;  %2945 = vmatprep.subr.bf16.mxu1 %v2944_v14  ;;  %v3378_v26 = vpop.eup %3377  ;;  %v2240_v43 = vmul.f32 %v3376_v56, %v2176_v47 }
 0x289   :  { %2947 = vmatpush3.bf16.msra.mxu1 %v2946_v41  ;;  %v3380_v34 = vpop.eup %3379 }
 0x28a   :  { %v2948_v63 = vpack.c.bf16 %v2236_v32, %v2235_v28  ;;  %v2224_v0 = vmul.f32 %v3380_v34, %v4642_v6 }
 0x28b   :  { %v2170_v46 = vpop.permute.xlu1 %2169  ;;  %v3079_v51 = vpop.permute.xlu0 %3078 }
 0x28c   :  { %v2237_v3 = vmul.f32 %v3372_v16, %v2170_v46  ;;  %2949 = vmatprep.subr.bf16.mxu1 %v2948_v63  ;;  %v3081_v42 = vunpack.i.h.bf16 %v3079_v51  ;;  %v3080_v49 = vunpack.i.l.bf16 %v3079_v51  ;;  %v2958_v23 = vpack.c.bf16 %v2224_v0, %v2223_v13 }
 0x28d   :  { %2951 = vmatpush3.bf16.msra.mxu1 %v2950_v24 }
 0x28e   :  { %v2952_v29 = vpack.c.bf16 %v2238_v8, %v2237_v3  ;;  %v2925_v12 = vpack.c.bf16 %v3081_v42, %v3080_v49 }
 0x28f   :  { %v2174_v41 = vpop.permute.xlu1 %2173 }
 0x290   :  { %v2239_v36 = vmul.f32 %v3378_v26, %v2174_v41  ;;  %2953 = vmatprep.subr.bf16.mxu1 %v2952_v29  ;;  %2927 = vmatpush3.bf16.xpose.msk.msra.mxu0 %vm4487_vm0, %v2925_v12 }
 0x291   :  { %2955 = vmatpush3.bf16.msra.mxu1 %v2954_v52 }
 0x292   :  { %v2956_v2 = vpack.c.bf16 %v2240_v43, %v2239_v36 }
 0x294   :  { %2957 = vmatprep.subr.bf16.mxu1 %v2956_v2 }
 0x295   :  { %2959 = vmatpush3.bf16.msra.mxu1 %v2958_v23 }
 0x297   :  { %2729 = vmatmul.mubr.msk.f32.vlgmr.msra.gmra.mrb[32].mxu0 %vm1300_vm3, %v4570_v40 }
 0x2b3   :  { %v1202_v33 = vpop.permute.xlu0 %1201 }
 0x2c6   :  { %v3114_v24 = vpop.trf.xlu1 }
 0x2c7   :  { %v3118_v62 = vunpack.i.h.bf16 %v3114_v24  ;;  %v3115_v20 = vunpack.i.l.bf16 %v3114_v24 }
 0x2c9   :  { %2369 = vmatprep.mubr.f32.mxu1 %v3115_v20 }
 0x2ca   :  { %v3119_v58 = vpop.trf.xlu1  ;;  %2370 = vmatmul.mubr.f32.vlgmr.msra.gmra.mrb[32].mxu1 %v3118_v62 }
 0x2cb   :  { %v3123_v6 = vunpack.i.h.bf16 %v3119_v58  ;;  %v3120_v9 = vunpack.i.l.bf16 %v3119_v58 }
 0x2cd   :  { %2374 = vmatprep.mubr.f32.mxu1 %v3120_v9 }
 0x2ce   :  { %2375 = vmatmul.mubr.f32.gmra.mrb[34].mxu1 %v3123_v6 }
 0x36a   :  { %v1434_v44 = vpop.f32.mrb[32].mxu0 }
 0x36b   :  { %v1435_v21 = vadd.f32 %v1434_v44, %v1202_v33  ;;  %v1436_v52 = vpop.f32.mrb[33].mxu0 }
 0x36c   :  { %v1437_v5 = vadd.f32 %v1436_v52, %v1202_v33 }
 0x36d   :  { %1439 = vst [vmem:[%s4725_s7] sm:$0xff] %v1435_v21 }
 0x36e   :  { %1440 = vst [vmem:[%s4725_s7 + $0x8] sm:$0xff] %v1437_v5 }
 0x39d   :  { %v2762_v40 = vpop.f32.mrb[32].mxu1 }
 0x39e   :  { %v2763_v4 = vpop.f32.mrb[33].mxu1 }
 0x39f   :  { %v2764_v10 = vadd.f32 %v2763_v4, %v2762_v40 }
 0x3a1   :  { %2385 = vst.msk [vmem:[%s4726_s6] sm:$0xff] %vm2384_vm6, %v2764_v10  ;;  %v2765_v45 = vpop.f32.mrb[34].mxu1 }
 0x3a2   :  { %v2766_v55 = vpop.f32.mrb[35].mxu1 }
 0x3a3   :  { %v2767_v7 = vadd.f32 %v2766_v55, %v2765_v45 }
 0x3a5   :  { %2386 = vst.msk [vmem:[%s4726_s6 + $0x8] sm:$0xff] %vm2384_vm6, %v2767_v7 }

</bundles_post_ra>
